<compile_context>
chip_gen: v5e
topology: v5e:2x2
jax: 0.10.0
libtpu: 0.0.40
codegen_flags: <defaults>
</compile_context>

<pallas_src>
import jax
import jax.numpy as jnp
from jax.experimental import pallas as pl
from jax.experimental.pallas import tpu as pltpu


def convkb_kernel(x_ref, w_ref, cb_ref, fcw_ref, sel_ref, fcb_ref, out_ref):
    # x_ref:   (L, TB*D)   activation tile, batch*dim on lanes (lane-dense)
    # w_ref:   (O, L)      conv weight
    # cb_ref:  (O, 1)      conv bias
    # fcw_ref: (O, TB*D)   fc weight, lane-tiled: fcw_ref[o, b*D+d] = fc_w[0, o*D+d]
    # sel_ref: (TB*D, TB)  block-diagonal selector: sel[b*D+d, b'] = (b == b')
    # fcb_ref: (1, 1)      fc bias
    # out_ref: (1, TB)     lane-dense per-tile scores

    # Conv2d(1, O, (1, L)) == (O, L) @ (L, TB*D) on the MXU; large dim lane-dense.
    y = jnp.dot(w_ref[...], x_ref[...], preferred_element_type=jnp.float32)
    y = jnp.maximum(y + cb_ref[...], 0.0)            # + bias, ReLU   (O, TB*D)
    # TODO(synk): nn.Dropout is identity at inference; drop_prob intentionally unused.

    # fc_layer: weight elementwise (VPU), then segmented per-batch lane reduce
    # as an MXU matmul against the block-diagonal selector -> (O, TB).
    z = y * fcw_ref[...]                                              # (O, TB*D)
    r = jnp.dot(z, sel_ref[...], preferred_element_type=jnp.float32)  # (O, TB)
    out = jnp.sum(r, axis=0, keepdims=True) + fcb_ref[...]            # (1, TB)
    out_ref[...] = out.astype(out_ref.dtype)


def convkb_forward(x_bld, conv_w, conv_b, fc_w, fc_b, *, tb=128):
    """x_bld: (B, L, D) like the PyTorch module's conv_input. Returns (B, 1)."""
    B, L, D = x_bld.shape
    O = conv_w.shape[0]

    tb = min(tb, B)
    assert B % tb == 0, "batch must be divisible by the batch tile"
    n_tiles = B // tb

    # Layout plumbing done once in the wrapper (not per grid step inside the kernel):
    xt = jnp.transpose(x_bld, (1, 0, 2)).reshape(L, B * D)          # x[b,l,d] -> xt[l, b*D+d]
    w = conv_w.reshape(O, L).astype(jnp.float32)                    # (O,1,1,L) -> (O, L)
    cb = conv_b.reshape(O, 1).astype(jnp.float32)
    fcw = jnp.tile(fc_w.reshape(O, D).astype(jnp.float32), (1, tb))  # (O, tb*D)
    fcb = fc_b.reshape(1, 1).astype(jnp.float32)
    # Block-diagonal selector for the segmented lane reduce (sum over d per batch).
    sel = (jnp.repeat(jnp.arange(tb), D)[:, None]
           == jnp.arange(tb)[None, :]).astype(jnp.float32)           # (tb*D, tb)

    out = pl.pallas_call(
        convkb_kernel,
        out_shape=jax.ShapeDtypeStruct((1, B), jnp.float32),
        grid=(n_tiles,),
        in_specs=[
            pl.BlockSpec((L, tb * D), lambda i: (0, i)),      # activations: tiled over batch
            pl.BlockSpec((O, L), lambda i: (0, 0)),           # conv weight: resident
            pl.BlockSpec((O, 1), lambda i: (0, 0)),           # conv bias:   resident
            pl.BlockSpec((O, tb * D), lambda i: (0, 0)),      # fc weight:   resident
            pl.BlockSpec((tb * D, tb), lambda i: (0, 0)),     # selector:    resident
            pl.BlockSpec((1, 1), lambda i: (0, 0)),           # fc bias:     resident
        ],
        out_specs=pl.BlockSpec((1, tb), lambda i: (0, i)),    # lane-dense output slab
        compiler_params=pltpu.CompilerParams(
            dimension_semantics=("parallel",),                # shards across v7x's 2 TCs
            vmem_limit_bytes=32 * 1024 * 1024,                # > v5e 16 MiB scoped default
        ),
    )(xt.astype(jnp.float32), w, cb, fcw, sel, fcb)

    return out.reshape(B, 1)                                   # (1, B) -> (B, 1)


def xavier_uniform(key, shape, fan_in, fan_out, gain):
    bound = gain * jnp.sqrt(6.0 / (fan_in + fan_out))
    return jax.random.uniform(key, shape, jnp.float32, -bound, bound)


def reference_forward(x_bld, conv_w, conv_b, fc_w, fc_b):
    B, L, D = x_bld.shape
    O = conv_w.shape[0]
    x = jnp.transpose(x_bld, (0, 2, 1))                         # (B, D, L)
    w = conv_w.reshape(O, L)
    y = jnp.einsum("bdl,ol->bod", x, w) + conv_b[None, :, None]  # (B, O, D)
    y = jnp.maximum(y, 0.0)
    flat = y.reshape(B, O * D)                                   # o-major flatten
    return flat @ fc_w.reshape(O * D, 1) + fc_b[None, :]


if __name__ == "__main__":
    # Module hyperparameters:
    #   input_dim D = 32, input_seq_len L = 8, in_channels = 1, out_channels O = 4.
    # Batch 256 with tile 128 so the grid actually pipelines (grid=(2,)) and the
    # lane dimension TB*D = 4096 is dense; total data is still tiny (~256 KiB).
    B, L, D, O = 256, 8, 32, 4
    TB = 128
    drop_prob, alpha_leaky = 0.0, 0.2  # unused at inference

    key = jax.random.PRNGKey(0)
    k_x, k_cw, k_cb, k_fw, k_fb = jax.random.split(key, 5)

    x = jax.random.normal(k_x, (B, L, D), dtype=jnp.float32)

    # Conv2d(1, O, (1, L)) weight: (O, 1, 1, L); xavier_uniform gain=1.414
    conv_w = xavier_uniform(k_cw, (O, 1, 1, L), fan_in=1 * 1 * L,
                            fan_out=O * 1 * L, gain=1.414)
    conv_b = jax.random.uniform(k_cb, (O,), jnp.float32,
                                -1.0 / jnp.sqrt(L), 1.0 / jnp.sqrt(L))

    # Linear(D * O, 1) weight: (1, O*D); xavier_uniform gain=1.414
    fc_w = xavier_uniform(k_fw, (1, O * D), fan_in=O * D, fan_out=1, gain=1.414)
    fc_b = jax.random.uniform(k_fb, (1,), jnp.float32,
                              -1.0 / jnp.sqrt(O * D), 1.0 / jnp.sqrt(O * D))

    out = convkb_forward(x, conv_w, conv_b, fc_w, fc_b, tb=TB)
    out = jax.block_until_ready(out)

    ref = reference_forward(x, conv_w, conv_b, fc_w, fc_b)
    assert out.shape == (B, 1)
    assert jnp.allclose(out, ref, atol=1e-4, rtol=1e-4), (out, ref)

    print("KERNEL_OK")
</pallas_src>

<mosaic_0001>
module attributes {stable_mosaic.version = 11 : i64} {
  func.func @convkb_kernel(%arg0: i32, %arg1: memref<8x4096xf32, #tpu.memory_space<vmem>>, %arg2: memref<4x8xf32, #tpu.memory_space<vmem>>, %arg3: memref<4x1xf32, #tpu.memory_space<vmem>>, %arg4: memref<4x4096xf32, #tpu.memory_space<vmem>>, %arg5: memref<4096x128xf32, #tpu.memory_space<vmem>>, %arg6: memref<1x1xf32, #tpu.memory_space<vmem>>, %arg7: memref<1x128xf32, #tpu.memory_space<vmem>>) attributes {dimension_semantics = [#tpu.dimension_semantics<parallel>], iteration_bounds = array<i64: 2>, scalar_prefetch = 0 : i64, scratch_operands = 0 : i64, tpu.core_type = #tpu.core_type<tc>, window_params = [{transform_indices = @transform_0, window_bounds = array<i64: 8, 4096>}, {pipeline_mode = #tpu.pipeline_mode<synchronous>, transform_indices = @transform_1, window_bounds = array<i64: 4, 8>}, {pipeline_mode = #tpu.pipeline_mode<synchronous>, transform_indices = @transform_2, window_bounds = array<i64: 4, 1>}, {pipeline_mode = #tpu.pipeline_mode<synchronous>, transform_indices = @transform_3, window_bounds = array<i64: 4, 4096>}, {pipeline_mode = #tpu.pipeline_mode<synchronous>, transform_indices = @transform_4, window_bounds = array<i64: 4096, 128>}, {pipeline_mode = #tpu.pipeline_mode<synchronous>, transform_indices = @transform_5, window_bounds = array<i64: 1, 1>}, {transform_indices = @transform_6, window_bounds = array<i64: 1, 128>}]} {
    %c0 = arith.constant 0 : index
    %c0_0 = arith.constant 0 : index
    %0 = vector.load %arg2[%c0, %c0_0] : memref<4x8xf32, #tpu.memory_space<vmem>>, vector<4x8xf32>
    %c0_1 = arith.constant 0 : index
    %c0_2 = arith.constant 0 : index
    %1 = vector.load %arg1[%c0_1, %c0_2] : memref<8x4096xf32, #tpu.memory_space<vmem>>, vector<8x4096xf32>
    %cst = arith.constant dense<0.000000e+00> : vector<4x4096xf32>
    %2 = tpu.matmul %0, %1, %cst {dimension_numbers = #tpu.dot_dimension_numbers<[1], [0], [0], [1], [0, 0, 1, 1], [], []>} : vector<4x8xf32>, vector<8x4096xf32>, vector<4x4096xf32> -> vector<4x4096xf32>
    %c0_3 = arith.constant 0 : index
    %c0_4 = arith.constant 0 : index
    %3 = vector.load %arg3[%c0_3, %c0_4] : memref<4x1xf32, #tpu.memory_space<vmem>>, vector<4x1xf32>
    %4 = vector.broadcast %3 : vector<4x1xf32> to vector<4x4096xf32>
    %5 = arith.addf %2, %4 : vector<4x4096xf32>
    %cst_5 = arith.constant 0.000000e+00 : f32
    %6 = vector.broadcast %cst_5 : f32 to vector<4x4096xf32>
    %7 = arith.maximumf %5, %6 : vector<4x4096xf32>
    %c0_6 = arith.constant 0 : index
    %c0_7 = arith.constant 0 : index
    %8 = vector.load %arg4[%c0_6, %c0_7] : memref<4x4096xf32, #tpu.memory_space<vmem>>, vector<4x4096xf32>
    %9 = arith.mulf %7, %8 : vector<4x4096xf32>
    %c0_8 = arith.constant 0 : index
    %c0_9 = arith.constant 0 : index
    %10 = vector.load %arg5[%c0_8, %c0_9] : memref<4096x128xf32, #tpu.memory_space<vmem>>, vector<4096x128xf32>
    %cst_10 = arith.constant dense<0.000000e+00> : vector<4x128xf32>
    %11 = tpu.matmul %9, %10, %cst_10 {dimension_numbers = #tpu.dot_dimension_numbers<[1], [0], [0], [1], [0, 0, 1, 1], [], []>} : vector<4x4096xf32>, vector<4096x128xf32>, vector<4x128xf32> -> vector<4x128xf32>
    %cst_11 = arith.constant dense<0.000000e+00> : vector<128xf32>
    %12 = vector.multi_reduction <add>, %11, %cst_11 [0] : vector<4x128xf32> to vector<128xf32>
    %13 = vector.shape_cast %12 : vector<128xf32> to vector<1x128xf32>
    %c0_12 = arith.constant 0 : index
    %c0_13 = arith.constant 0 : index
    %14 = vector.load %arg6[%c0_12, %c0_13] : memref<1x1xf32, #tpu.memory_space<vmem>>, vector<1x1xf32>
    %15 = vector.broadcast %14 : vector<1x1xf32> to vector<1x128xf32>
    %16 = arith.addf %13, %15 : vector<1x128xf32>
    %c0_14 = arith.constant 0 : index
    %c0_15 = arith.constant 0 : index
    %17 = vector.load %arg7[%c0_14, %c0_15] : memref<1x128xf32, #tpu.memory_space<vmem>>, vector<1x128xf32>
    tpu.vector_store %arg7[%c0_14, %c0_15], %16 {strides = array<i32>} : memref<1x128xf32, #tpu.memory_space<vmem>>, vector<1x128xf32>,
    return
  }
  func.func @transform_0(%arg0: i32) -> (i32, i32) {
    %c0_i32 = arith.constant 0 : i32
    %c0_i32_0 = arith.constant 0 : i32
    return %c0_i32, %arg0 : i32, i32
  }
  func.func @transform_1(%arg0: i32) -> (i32, i32) {
    %c0_i32 = arith.constant 0 : i32
    %c0_i32_0 = arith.constant 0 : i32
    %c0_i32_1 = arith.constant 0 : i32
    return %c0_i32, %c0_i32_0 : i32, i32
  }
  func.func @transform_2(%arg0: i32) -> (i32, i32) {
    %c0_i32 = arith.constant 0 : i32
    %c0_i32_0 = arith.constant 0 : i32
    %c0_i32_1 = arith.constant 0 : i32
    return %c0_i32, %c0_i32_0 : i32, i32
  }
  func.func @transform_3(%arg0: i32) -> (i32, i32) {
    %c0_i32 = arith.constant 0 : i32
    %c0_i32_0 = arith.constant 0 : i32
    %c0_i32_1 = arith.constant 0 : i32
    return %c0_i32, %c0_i32_0 : i32, i32
  }
  func.func @transform_4(%arg0: i32) -> (i32, i32) {
    %c0_i32 = arith.constant 0 : i32
    %c0_i32_0 = arith.constant 0 : i32
    %c0_i32_1 = arith.constant 0 : i32
    return %c0_i32, %c0_i32_0 : i32, i32
  }
  func.func @transform_5(%arg0: i32) -> (i32, i32) {
    %c0_i32 = arith.constant 0 : i32
    %c0_i32_0 = arith.constant 0 : i32
    %c0_i32_1 = arith.constant 0 : i32
    return %c0_i32, %c0_i32_0 : i32, i32
  }
  func.func @transform_6(%arg0: i32) -> (i32, i32) {
    %c0_i32 = arith.constant 0 : i32
    %c0_i32_0 = arith.constant 0 : i32
    return %c0_i32, %arg0 : i32, i32
  }
}

</mosaic_0001>

<bundles_post_ra>
// kernel: tpu_custom_call.1
= control target key start
LH: loop header
LB: loop body
LE: loop exit
PB: predicated region body
PF: predicated region fallthrough
CT: control target
= control target key end

     0   :  { %s3243_s0 = inlined_call_operand.hbm [shape: f32[8,8192], index: 0, kind: input, shape index: {}]   ;;  %s3244_s1 = inlined_call_operand.hbm [shape: f32[4,8], index: 1, kind: input, shape index: {}]   ;;  %s3245_s2 = inlined_call_operand.vmem [shape: f32[4,1], index: 2, kind: input, shape index: {}]   ;;  %s3246_s3 = inlined_call_operand.hbm [shape: f32[4,4096], index: 3, kind: input, shape index: {}]   ;;  %s3247_s4 = inlined_call_operand.hbm [shape: f32[4096,128], index: 4, kind: input, shape index: {}]   ;;  %s3248_s5 = inlined_call_operand.<no memory space> [shape: f32[1,1], index: 5, kind: input, shape index: {}]   ;;  %s3249_s6 = inlined_call_operand.hbm [shape: f32[1,256], index: 6, kind: output, shape index: {}]  }
   0x1   :  { %v11_v0 = vstv %s3248_s5 }
   0x2   :  { %12 = vst [vmem:[#allocation2] sm:$0x1] %v11_v0 }
   0x3   :  { %13 = vsyncpa [#allocation4], 0 }
   0x4   :  { %15 = vsyncpa [#allocation4 + $0x1], 0 }
   0x5   :  { %16 = vsyncpa [#allocation7], 0 }
   0x6   :  { %17 = vsyncpa [#allocation10], 0 }
   0x7   :  { %18 = vsyncpa [#allocation5], 0 }
   0x8   :  { %20 = vsyncpa [#allocation5 + $0x1], 0  ;;  %s2827_s23 = smov 0   ;;  %s2829_s24 = smov 0  }
   0x9   :  { %s2831_s25 = smov 0   ;;  %s2833_s26 = smov 0  }
   0xa LB: > { %s2848_s5 = sadd.s32 4294967295, %s2781_s26   ;;  %s2457_s27 = sadd.s32 4294967294, %s2781_s26   ;;  %s2781_s26 = sphi %s2833_s26, %s3260_s26   ;;  %s2777_s25 = sphi %s2831_s25, %s3259_s25   ;;  %s2773_s24 = sphi %s2829_s24, %s3258_s24   ;;  %s2769_s23 = sphi %s2827_s23, %s3257_s23  }
   0xb   : > { %p46_p0 = scmp.ne.s32.totalorder %s2773_s24, %s2769_s23  ;;  %p47_p1 = scmp.eq.s32.totalorder %s2848_s5, 0 }
   0xc   : > { %p175_p2 = scmp.eq.s32.totalorder %s2848_s5, 1  ;;  %p181_p3 = scmp.eq.s32.totalorder %s2457_s27, 1 }
   0xd   : > { %p2857_p4 = por %p47_p1, %p46_p0  ;;  %p2458_p5 = scmp.ge.s32.totalorder %s2781_s26, 1 }
   0xe   : > { %p2862_p6 = por %p181_p3, %p46_p0  ;;  %p188_p7 = scmp.lt.s32.totalorder %s2781_s26, 3 }
   0xf   : > { %s200_s8 = sshll.u32 %s3244_s1, 4  ;;  %s2783_s10 = smov [#allocation6]   ;;  %s201_s8 = int_to_ptr.hbm [resolvable:$true] %s200_s8 }
  0x10   : > { %p2870_p8 = pnand %p2458_p5, %p188_p7  ;;  %s202_s11 = sshll.u32 %s2783_s10, 4  ;;  %s203_s11 = int_to_ptr.vmem [resolvable:$true] %s202_s11 }
  0x11   : > { %s215_s14 = sshll.u32 %s3246_s3, 4  ;;  %s226_s18 = sshll.u32 %s3247_s4, 4  ;;  %s216_s14 = int_to_ptr.hbm [resolvable:$true] %s215_s14  ;;  %s227_s18 = int_to_ptr.hbm [resolvable:$true] %s226_s18 }
  0x12   : > { %p2522_p10 = pneg %p2870_p8  ;;  %s2784_s19 = smov [#allocation8]  }
  0x13   : > { %s217_s20 = sshll.u32 %s2784_s19, 4  ;;  %s2785_s21 = smov [#allocation9]   ;;  %s218_s20 = int_to_ptr.vmem [resolvable:$true] %s217_s20 }
  0x14   : > { %p2882_p11 = pnand %p2522_p10, %p47_p1  ;;  %s228_s22 = sshll.u32 %s2785_s21, 4  ;;  %s229_s22 = int_to_ptr.vmem [resolvable:$true] %s228_s22 }
  0x15   : > { %s2786_s27 = smov 128   ;;  %s2787_s30 = smov 8  }
  0x16   : > { %2525 = dma.hbm_to_vmem [thread:$0]  (!%p2882_p11), %s201_s8, 64, %s203_s11, [#allocation7]  }
  0x17   : > { %2528 = dma.hbm_to_vmem [thread:$0]  (!%p2882_p11), %s216_s14, 2048, %s218_s20, [#allocation7]  }
  0x18   : > { %2531 = dma.hbm_to_vmem [thread:$0]  (!%p2882_p11), %s227_s18, 65536, %s229_s22, [#allocation10], %s2786_s27, %s2786_s27, %s2787_s30  }
  0x19   : > { %s2896_s7 = sadd.s32 1, %s2781_s26   ;;  %s33_s10 = sadd.s32 1, %s2777_s25 }
  0x1a   : > { %s30_s8 = ssub.s32 %s2781_s26, %s2896_s7  ;;  %p40_p13 = scmp.ne.s32.totalorder %s2777_s25, %s2773_s24 }
  0x1b   : > { %p31_p12 = scmp.eq.s32.totalorder %s30_s8, 0  ;;  %p41_p0 = scmp.eq.s32.totalorder %s2781_s26, 0 }
  0x1c   : > { %p2909_p3 = por %p175_p2, %p40_p13  ;;  %p2543_p5 = scmp.lt.s32.totalorder %s2781_s26, 2 }
  0x1d   : > { %s2905_s11 = scalar_select %p31_p12, %s2777_s25, %s33_s10  }
  0x1e   : > { %s245_s13 = sand.u32 1, %s2777_s25   ;;  %s2505_s14 = sshll.u32 %s2781_s26, 8 }
  0x1f   : > { %p42_p7 = por %p41_p0, %p40_p13  ;;  %s2463_s15 = sshll.u32 %s245_s13, 8 }
  0x20   : > { %s254_s18 = scalar_lea.hbm %s3243_s0, %s2505_s14  ;;  %s249_s20 = scalar_lea.vmem [#allocation3], %s2463_s15 }
  0x21   : > { %s256_s19 = sshll.u32 %s254_s18, 4  ;;  %s258_s21 = sshll.u32 %s249_s20, 4  ;;  %s257_s19 = int_to_ptr.hbm [resolvable:$true] %s256_s19  ;;  %s259_s21 = int_to_ptr.vmem [resolvable:$true] %s258_s21 }
  0x22   : > { %p2919_p10 = pnand %p2543_p5, %p42_p7  ;;  %s246_s27 = scalar_lea.sflag [#allocation4], %s245_s13 }
  0x23   : > { %s2677_s30 = sshra.s32 %s257_s19, 4  ;;  %s2684_s15 = scalar_lea.hbm %s3243_s0, 512  ;;  %s2678_s30 = int_to_ptr.hbm [resolvable:$true] %s2677_s30 }
  0x24   : > { %s2679_s8 = scalar_lea.hbm %s2678_s30, 256  ;;  %p2681_p11 = pneg %p2919_p10 }
  0x25   : > { %p2680_p2 = scmp.ne.s32.totalorder %s2678_s30, %s2679_s8  ;;  %p2685_p0 = scmp.lt.s32.totalorder %s2678_s30, %s3243_s0 }
  0x26   : > { %p2686_p5 = scmp.lt.s32.totalorder %s2684_s15, %s2679_s8 }
  0x27   : > { %p2682_p12 = pnand %p2681_p11, %p2680_p2 }
  0x28   : > { %p2687_p7 = por %p2686_p5, %p2685_p0 }
  0x29   : > { %p2683_p13 = pneg %p2682_p12 }
  0x2b   : > { %p2688_p9 = pnand %p2687_p7, %p2683_p13 }
  0x2d   : > { %2691 = shalt.err (!%p2688_p9)
}
  0x2e   : > { %2535 = dma.hbm_to_vmem [thread:$0]  (!%p2919_p10), %s257_s19, 4096, %s259_s21, %s246_s27  }
  0x2f   : > { %267 = sbr.rel (%p2870_p8) target bundleno = 558 (0x22e), region = 44  ;;  %s2936_s13 = sand.u32 (!%p2870_p8), 1, %s2773_s24  }
  0x30   : > { %s2467_s18 = sshll.u32 (!%p2870_p8), %s2936_s13, 8  ;;  %s270_s20 = scalar_lea.sflag (!%p2870_p8), [#allocation4], %s2936_s13 }
  0x31   : > { %s2940_s10 = scalar_lea.vmem (!%p2870_p8), [#allocation3], %s2467_s18 }
  0x34   : > { %2752 = dma.done.wait (%p2857_p4), %s270_s20, 4096  }
  0x35   : > { %2754 = vsyncadd (%p2857_p4), %s270_s20, 4294963200 }
  0x36   : > { %2756 = dma.done.wait (%p47_p1), [#allocation7], 2112  }
  0x37   : > { %2758 = vsyncadd (%p47_p1), [#allocation7], 4294965184 }
  0x38   : > { %2760 = dma.done.wait (%p47_p1), [#allocation10], 65536  }
  0x39   : > { %2762 = vsyncadd (%p47_p1), [#allocation10], 4294901760  ;;  %v2788_v1 = vmov 0   ;;  %v319_v2 = vld [vmem:[%s2940_s10] sm:$0xff]  ;;  %v320_v3 = vld [vmem:[%s2940_s10 + $0x8] sm:$0xff]  ;;  %vm357_vm0 = vcmask 64512   ;;  %s2358_s22 = scalar_lea.hbm %s3249_s6, %s2848_s5 }
  0x3a   : > { %2586 = vset.pattern.permute.xlu0 %v2788_v1  ;;  %v321_v4 = vld [vmem:[%s2940_s10 + $0x10] sm:$0xff]  ;;  %376 = vmatpush.msra.mxu0 %v319_v2  ;;  %v322_v5 = vld [vmem:[%s2940_s10 + $0x18] sm:$0xff]  ;;  %v2958_v6 = vld [vmem:[#allocation6] sm:$0xf]  ;;  %vm2332_vm1 = vcmask 1043456   ;;  %s316_s27 = scalar_lea.vmem [#allocation11], %s2936_s13 }
  0x3b   : > { %396 = vmatpush.msra.mxu1 %v320_v3  ;;  %416 = vmatpush.msra.mxu2 %v321_v4  ;;  %v323_v7 = vld [vmem:[%s2940_s10 + $0x20] sm:$0xff]  ;;  %v324_v8 = vld [vmem:[%s2940_s10 + $0x28] sm:$0xff]  ;;  %v325_v9 = vld [vmem:[%s2940_s10 + $0x30] sm:$0xff]  ;;  %s2360_s30 = sshll.u32 %s316_s27, 4  ;;  %s2362_s8 = sshll.u32 %s2358_s22, 4  ;;  %s2361_s30 = int_to_ptr.vmem [resolvable:$true] %s2360_s30  ;;  %s2363_s8 = int_to_ptr.hbm [resolvable:$true] %s2362_s8 }
  0x3c   : > { %436 = vmatpush.msra.mxu3 %v322_v5  ;;  %2471 = vmatmul.msk.f32.vlgmr.msra.gmra.mxu0 %vm357_vm0, %v2958_v6  ;;  %v326_v10 = vld [vmem:[%s2940_s10 + $0x38] sm:$0xff]  ;;  %v327_v12 = vld [vmem:[%s2940_s10 + $0x40] sm:$0xff]  ;;  %v328_v13 = vld [vmem:[%s2940_s10 + $0x48] sm:$0xff]  ;;  %s2350_s14 = scalar_lea.sflag [#allocation5], %s2936_s13  ;;  %s2721_s15 = sshra.s32 %s2363_s8, 4  ;;  %s2722_s15 = int_to_ptr.hbm [resolvable:$true] %s2721_s15 }
  0x3d   : > { %2472 = vmatmul.msk.f32.vlgmr.msra.gmra.mxu1 %vm357_vm0, %v2958_v6  ;;  %2473 = vmatmul.msk.f32.vlgmr.msra.gmra.mxu2 %vm357_vm0, %v2958_v6  ;;  %v351_v11 = vld [vmem:[%s3245_s2] sm:$0xf]  ;;  %v331_v16 = vld [vmem:[%s2940_s10 + $0x60] sm:$0xff]  ;;  %v332_v17 = vld [vmem:[%s2940_s10 + $0x68] sm:$0xff]  ;;  %s2723_s16 = scalar_lea.hbm %s2722_s15, 1  ;;  %s2727_s18 = scalar_lea.hbm %s3249_s6, 2 }
  0x3e   : > { %2474 = vmatmul.msk.f32.vlgmr.msra.gmra.mxu3 %vm357_vm0, %v2958_v6  ;;  %456 = vmatpush.msrb.mxu0 %v323_v7  ;;  %v329_v14 = vld [vmem:[%s2940_s10 + $0x50] sm:$0xff]  ;;  %v330_v15 = vld [vmem:[%s2940_s10 + $0x58] sm:$0xff]  ;;  %v335_v21 = vld [vmem:[%s2940_s10 + $0x80] sm:$0xff]  ;;  %p2724_p1 = scmp.ne.s32.totalorder %s2722_s15, %s2723_s16  ;;  %p2728_p9 = scmp.lt.s32.totalorder %s2722_s15, %s3249_s6 }
  0x3f   : > { %476 = vmatpush.msrb.mxu1 %v324_v8  ;;  %496 = vmatpush.msrb.mxu2 %v325_v9  ;;  %v333_v18 = vld [vmem:[%s2940_s10 + $0x70] sm:$0xff]  ;;  %v334_v19 = vld [vmem:[%s2940_s10 + $0x78] sm:$0xff]  ;;  %v336_v22 = vld [vmem:[%s2940_s10 + $0x88] sm:$0xff]  ;;  %p2729_p10 = scmp.lt.s32.totalorder %s2727_s18, %s2723_s16 }
  0x40   : > { %516 = vmatpush.msrb.mxu3 %v326_v10  ;;  %354 = vperm.xlu0 %2586, %v351_v11   ;;  %v2340_v20 = vld [vmem:[#allocation2] sm:$0x1]  ;;  %v337_v23 = vld [vmem:[%s2940_s10 + $0x90] sm:$0xff]  ;;  %v339_v25 = vld [vmem:[%s2940_s10 + $0xa0] sm:$0xff]  ;;  %p2725_p4 = pnand %p2724_p1, %p2909_p3 }
  0x41   : > { %536 = vmatpush.msra.mxu0 %v327_v12  ;;  %556 = vmatpush.msra.mxu1 %v328_v13  ;;  %v338_v24 = vld [vmem:[%s2940_s10 + $0x98] sm:$0xff]  ;;  %v340_v26 = vld [vmem:[%s2940_s10 + $0xa8] sm:$0xff]  ;;  %v341_v27 = vld [vmem:[%s2940_s10 + $0xb0] sm:$0xff]  ;;  %p2730_p2 = por %p2729_p10, %p2728_p9 }
  0x42   : > { %576 = vmatpush.msra.mxu2 %v329_v14  ;;  %596 = vmatpush.msra.mxu3 %v330_v15  ;;  %v342_v28 = vld [vmem:[%s2940_s10 + $0xb8] sm:$0xff]  ;;  %v343_v29 = vld [vmem:[%s2940_s10 + $0xc0] sm:$0xff]  ;;  %v344_v30 = vld [vmem:[%s2940_s10 + $0xc8] sm:$0xff]  ;;  %p2726_p8 = pneg %p2725_p4 }
  0x43   : > { %v345_v31 = vld [vmem:[%s2940_s10 + $0xd0] sm:$0xff]  ;;  %v346_v32 = vld [vmem:[%s2940_s10 + $0xd8] sm:$0xff]  ;;  %v347_v33 = vld [vmem:[%s2940_s10 + $0xe0] sm:$0xff] }
  0x44   : > { %2475 = vmatmul.msk.f32.vlgmr.msrb.gmra.mxu0 %vm357_vm0, %v2958_v6  ;;  %v348_v34 = vld [vmem:[%s2940_s10 + $0xe8] sm:$0xff]  ;;  %v349_v35 = vld [vmem:[%s2940_s10 + $0xf0] sm:$0xff]  ;;  %v350_v36 = vld [vmem:[%s2940_s10 + $0xf8] sm:$0xff]  ;;  %p2731_p11 = pnand %p2730_p2, %p2726_p8 }
  0x45   : > { %2476 = vmatmul.msk.f32.vlgmr.msrb.gmra.mxu1 %vm357_vm0, %v2958_v6  ;;  %2477 = vmatmul.msk.f32.vlgmr.msrb.gmra.mxu2 %vm357_vm0, %v2958_v6  ;;  %v1195_v37 = vld [vmem:[#allocation9 + $0x78] sm:$0xff]  ;;  %v1194_v41 = vld [vmem:[#allocation9 + $0x70] sm:$0xff]  ;;  %v1193_v45 = vld [vmem:[#allocation9 + $0x68] sm:$0xff] }
  0x46   : > { %2478 = vmatmul.msk.f32.vlgmr.msrb.gmra.mxu3 %vm357_vm0, %v2958_v6  ;;  %616 = vmatpush.msrb.mxu0 %v331_v16  ;;  %v1211_v38 = vld [vmem:[#allocation9 + $0xf8] sm:$0xff]  ;;  %v1210_v42 = vld [vmem:[#allocation9 + $0xf0] sm:$0xff]  ;;  %v1209_v46 = vld [vmem:[#allocation9 + $0xe8] sm:$0xff] }
  0x47   : > { %636 = vmatpush.msrb.mxu1 %v332_v17  ;;  %656 = vmatpush.msrb.mxu2 %v333_v18  ;;  %v1227_v39 = vld [vmem:[#allocation9 + $0x178] sm:$0xff]  ;;  %v1226_v43 = vld [vmem:[#allocation9 + $0x170] sm:$0xff]  ;;  %v1225_v47 = vld [vmem:[#allocation9 + $0x168] sm:$0xff] }
  0x48   : > { %676 = vmatpush.msrb.mxu3 %v334_v19  ;;  %2343 = vperm.xlu0 %2586, %v2340_v20   ;;  %v1243_v40 = vld [vmem:[#allocation9 + $0x1f8] sm:$0xff]  ;;  %v1242_v44 = vld [vmem:[#allocation9 + $0x1f0] sm:$0xff]  ;;  %v1241_v48 = vld [vmem:[#allocation9 + $0x1e8] sm:$0xff] }
  0x49   : > { %v1192_v49 = vld [vmem:[#allocation9 + $0x60] sm:$0xff]  ;;  %v1191_v53 = vld [vmem:[#allocation9 + $0x58] sm:$0xff]  ;;  %v1190_v57 = vld [vmem:[#allocation9 + $0x50] sm:$0xff] }
  0x4a   : > { %v1208_v50 = vld [vmem:[#allocation9 + $0xe0] sm:$0xff]  ;;  %v1207_v54 = vld [vmem:[#allocation9 + $0xd8] sm:$0xff]  ;;  %v1206_v58 = vld [vmem:[#allocation9 + $0xd0] sm:$0xff] }
  0x4b   : > { %v1224_v51 = vld [vmem:[#allocation9 + $0x160] sm:$0xff]  ;;  %v1223_v55 = vld [vmem:[#allocation9 + $0x158] sm:$0xff]  ;;  %v1222_v59 = vld [vmem:[#allocation9 + $0x150] sm:$0xff] }
  0x4c   : > { %2479 = vmatmul.msk.f32.vlgmr.msra.gmra.mxu0 %vm357_vm0, %v2958_v6  ;;  %v1240_v52 = vld [vmem:[#allocation9 + $0x1e0] sm:$0xff]  ;;  %v1239_v56 = vld [vmem:[#allocation9 + $0x1d8] sm:$0xff]  ;;  %v1238_v60 = vld [vmem:[#allocation9 + $0x1d0] sm:$0xff] }
  0x4d   : > { %2480 = vmatmul.msk.f32.vlgmr.msra.gmra.mxu1 %vm357_vm0, %v2958_v6  ;;  %2481 = vmatmul.msk.f32.vlgmr.msra.gmra.mxu2 %vm357_vm0, %v2958_v6  ;;  %v1189_v61 = vld [vmem:[#allocation9 + $0x48] sm:$0xff]  ;;  %v1188_v1 = vld [vmem:[#allocation9 + $0x40] sm:$0xff]  ;;  %v1187_v5 = vld [vmem:[#allocation9 + $0x38] sm:$0xff] }
  0x4e   : > { %2482 = vmatmul.msk.f32.vlgmr.msra.gmra.mxu3 %vm357_vm0, %v2958_v6  ;;  %696 = vmatpush.msra.mxu0 %v335_v21  ;;  %v1205_v62 = vld [vmem:[#allocation9 + $0xc8] sm:$0xff]  ;;  %v1204_v2 = vld [vmem:[#allocation9 + $0xc0] sm:$0xff]  ;;  %v1219_v7 = vld [vmem:[#allocation9 + $0x138] sm:$0xff] }
  0x4f   : > { %716 = vmatpush.msra.mxu1 %v336_v22  ;;  %736 = vmatpush.msra.mxu2 %v337_v23  ;;  %v1221_v63 = vld [vmem:[#allocation9 + $0x148] sm:$0xff]  ;;  %v1220_v3 = vld [vmem:[#allocation9 + $0x140] sm:$0xff]  ;;  %v1235_v8 = vld [vmem:[#allocation9 + $0x1b8] sm:$0xff] }
  0x50   : > { %756 = vmatpush.msra.mxu3 %v338_v24  ;;  %v1237_v0 = vld [vmem:[#allocation9 + $0x1c8] sm:$0xff]  ;;  %v1236_v4 = vld [vmem:[#allocation9 + $0x1c0] sm:$0xff]  ;;  %v1186_v9 = vld [vmem:[#allocation9 + $0x30] sm:$0xff] }
  0x51   : > { %v1202_v10 = vld [vmem:[#allocation9 + $0xb0] sm:$0xff]  ;;  %v1185_v13 = vld [vmem:[#allocation9 + $0x28] sm:$0xff]  ;;  %v1184_v17 = vld [vmem:[#allocation9 + $0x20] sm:$0xff] }
  0x52   : > { %v1218_v11 = vld [vmem:[#allocation9 + $0x130] sm:$0xff]  ;;  %v1201_v14 = vld [vmem:[#allocation9 + $0xa8] sm:$0xff]  ;;  %v1200_v18 = vld [vmem:[#allocation9 + $0xa0] sm:$0xff] }
  0x53   : > { %v1234_v12 = vld [vmem:[#allocation9 + $0x1b0] sm:$0xff]  ;;  %v1217_v15 = vld [vmem:[#allocation9 + $0x128] sm:$0xff]  ;;  %v1216_v19 = vld [vmem:[#allocation9 + $0x120] sm:$0xff] }
  0x54   : > { %2483 = vmatmul.msk.f32.vlgmr.msrb.gmra.mxu0 %vm357_vm0, %v2958_v6  ;;  %v1233_v16 = vld [vmem:[#allocation9 + $0x1a8] sm:$0xff]  ;;  %v1232_v20 = vld [vmem:[#allocation9 + $0x1a0] sm:$0xff]  ;;  %v1183_v21 = vld [vmem:[#allocation9 + $0x18] sm:$0xff] }
  0x55   : > { %2484 = vmatmul.msk.f32.vlgmr.msrb.gmra.mxu1 %vm357_vm0, %v2958_v6  ;;  %2485 = vmatmul.msk.f32.vlgmr.msrb.gmra.mxu2 %vm357_vm0, %v2958_v6  ;;  %v1199_v22 = vld [vmem:[#allocation9 + $0x98] sm:$0xff] }
  0x56   : > { %2486 = vmatmul.msk.f32.vlgmr.msrb.gmra.mxu3 %vm357_vm0, %v2958_v6  ;;  %776 = vmatpush.msrb.mxu0 %v339_v25  ;;  %v1215_v23 = vld [vmem:[#allocation9 + $0x118] sm:$0xff]  ;;  %v1182_v25 = vld [vmem:[#allocation9 + $0x10] sm:$0xff] }
  0x57   : > { %796 = vmatpush.msrb.mxu1 %v340_v26  ;;  %816 = vmatpush.msrb.mxu2 %v341_v27  ;;  %v1231_v24 = vld [vmem:[#allocation9 + $0x198] sm:$0xff]  ;;  %v1198_v26 = vld [vmem:[#allocation9 + $0x90] sm:$0xff] }
  0x58   : > { %836 = vmatpush.msrb.mxu3 %v342_v28  ;;  %v1214_v27 = vld [vmem:[#allocation9 + $0x110] sm:$0xff] }
  0x59   : > { %v1230_v28 = vld [vmem:[#allocation9 + $0x190] sm:$0xff] }
  0x5c   : > { %2487 = vmatmul.msk.f32.vlgmr.msra.gmra.mxu0 %vm357_vm0, %v2958_v6 }
  0x5d   : > { %2488 = vmatmul.msk.f32.vlgmr.msra.gmra.mxu1 %vm357_vm0, %v2958_v6  ;;  %2489 = vmatmul.msk.f32.vlgmr.msra.gmra.mxu2 %vm357_vm0, %v2958_v6 }
  0x5e   : > { %2490 = vmatmul.msk.f32.vlgmr.msra.gmra.mxu3 %vm357_vm0, %v2958_v6  ;;  %856 = vmatpush.msra.mxu0 %v343_v29  ;;  %v1181_v29 = vld [vmem:[#allocation9 + $0x8] sm:$0xff] }
  0x5f   : > { %876 = vmatpush.msra.mxu1 %v344_v30  ;;  %896 = vmatpush.msra.mxu2 %v345_v31  ;;  %v1197_v30 = vld [vmem:[#allocation9 + $0x88] sm:$0xff] }
  0x60   : > { %916 = vmatpush.msra.mxu3 %v346_v32  ;;  %v1213_v31 = vld [vmem:[#allocation9 + $0x108] sm:$0xff] }
  0x61   : > { %v1229_v32 = vld [vmem:[#allocation9 + $0x188] sm:$0xff] }
  0x64   : > { %2491 = vmatmul.msk.f32.vlgmr.msrb.gmra.mxu0 %vm357_vm0, %v2958_v6 }
  0x65   : > { %2492 = vmatmul.msk.f32.vlgmr.msrb.gmra.mxu1 %vm357_vm0, %v2958_v6  ;;  %2493 = vmatmul.msk.f32.vlgmr.msrb.gmra.mxu2 %vm357_vm0, %v2958_v6 }
  0x66   : > { %2494 = vmatmul.msk.f32.vlgmr.msrb.gmra.mxu3 %vm357_vm0, %v2958_v6  ;;  %936 = vmatpush.msrb.mxu0 %v347_v33  ;;  %v1180_v33 = vld [vmem:[#allocation9] sm:$0xff] }
  0x67   : > { %956 = vmatpush.msrb.mxu1 %v348_v34  ;;  %976 = vmatpush.msrb.mxu2 %v349_v35  ;;  %v1196_v34 = vld [vmem:[#allocation9 + $0x80] sm:$0xff]  ;;  %v1259_v35 = vld [vmem:[#allocation9 + $0x278] sm:$0xff] }
  0x68   : > { %996 = vmatpush.msrb.mxu3 %v350_v36  ;;  %v1275_v36 = vld [vmem:[#allocation9 + $0x2f8] sm:$0xff] }
  0x6c   : > { %2495 = vmatmul.msk.f32.vlgmr.msra.gmra.mxu0 %vm357_vm0, %v2958_v6 }
  0x6d   : > { %2496 = vmatmul.msk.f32.vlgmr.msra.gmra.mxu1 %vm357_vm0, %v2958_v6  ;;  %2497 = vmatmul.msk.f32.vlgmr.msra.gmra.mxu2 %vm357_vm0, %v2958_v6 }
  0x6e   : > { %2498 = vmatmul.msk.f32.vlgmr.msra.gmra.mxu3 %vm357_vm0, %v2958_v6  ;;  %1692 = vmatpush.msra.mxu0 %v1195_v37  ;;  %v1212_v37 = vld [vmem:[#allocation9 + $0x100] sm:$0xff] }
  0x6f   : > { %1712 = vmatpush.msra.mxu1 %v1211_v38  ;;  %1732 = vmatpush.msra.mxu2 %v1227_v39  ;;  %v1228_v38 = vld [vmem:[#allocation9 + $0x180] sm:$0xff]  ;;  %v1258_v39 = vld [vmem:[#allocation9 + $0x270] sm:$0xff] }
  0x70   : > { %1752 = vmatpush.msra.mxu3 %v1243_v40  ;;  %1693 = vmatpush.msra.mxu0 %v1194_v41  ;;  %v1274_v40 = vld [vmem:[#allocation9 + $0x2f0] sm:$0xff]  ;;  %v1291_v41 = vld [vmem:[#allocation9 + $0x378] sm:$0xff] }
  0x71   : > { %1713 = vmatpush.msra.mxu1 %v1210_v42  ;;  %1733 = vmatpush.msra.mxu2 %v1226_v43  ;;  %v1307_v42 = vld [vmem:[#allocation9 + $0x3f8] sm:$0xff]  ;;  %v1257_v43 = vld [vmem:[#allocation9 + $0x268] sm:$0xff] }
  0x72   : > { %1753 = vmatpush.msra.mxu3 %v1242_v44  ;;  %1694 = vmatpush.msra.mxu0 %v1193_v45  ;;  %v1273_v44 = vld [vmem:[#allocation9 + $0x2e8] sm:$0xff]  ;;  %v1290_v45 = vld [vmem:[#allocation9 + $0x370] sm:$0xff] }
  0x73   : > { %1714 = vmatpush.msra.mxu1 %v1209_v46  ;;  %1734 = vmatpush.msra.mxu2 %v1225_v47  ;;  %v1306_v46 = vld [vmem:[#allocation9 + $0x3f0] sm:$0xff]  ;;  %v1256_v47 = vld [vmem:[#allocation9 + $0x260] sm:$0xff] }
  0x74   : > { %1754 = vmatpush.msra.mxu3 %v1241_v48  ;;  %2499 = vmatmul.msk.f32.vlgmr.msrb.gmra.mxu0 %vm357_vm0, %v2958_v6  ;;  %v1272_v48 = vld [vmem:[#allocation9 + $0x2e0] sm:$0xff] }
  0x75   : > { %2500 = vmatmul.msk.f32.vlgmr.msrb.gmra.mxu1 %vm357_vm0, %v2958_v6  ;;  %2501 = vmatmul.msk.f32.vlgmr.msrb.gmra.mxu2 %vm357_vm0, %v2958_v6 }
  0x76   : > { %2502 = vmatmul.msk.f32.vlgmr.msrb.gmra.mxu3 %vm357_vm0, %v2958_v6  ;;  %1695 = vmatpush.msra.mxu0 %v1192_v49  ;;  %v1203_v6 = vld [vmem:[#allocation9 + $0xb8] sm:$0xff]  ;;  %v1289_v49 = vld [vmem:[#allocation9 + $0x368] sm:$0xff] }
  0x77   : > { %1715 = vmatpush.msra.mxu1 %v1208_v50  ;;  %1735 = vmatpush.msra.mxu2 %v1224_v51  ;;  %v1305_v50 = vld [vmem:[#allocation9 + $0x3e8] sm:$0xff]  ;;  %v1255_v51 = vld [vmem:[#allocation9 + $0x258] sm:$0xff] }
  0x78   : > { %1755 = vmatpush.msra.mxu3 %v1240_v52  ;;  %1696 = vmatpush.msra.mxu0 %v1191_v53  ;;  %v1271_v52 = vld [vmem:[#allocation9 + $0x2d8] sm:$0xff]  ;;  %v1288_v53 = vld [vmem:[#allocation9 + $0x360] sm:$0xff] }
  0x79   : > { %1716 = vmatpush.msra.mxu1 %v1207_v54  ;;  %1736 = vmatpush.msra.mxu2 %v1223_v55  ;;  %v1304_v54 = vld [vmem:[#allocation9 + $0x3e0] sm:$0xff]  ;;  %v1254_v55 = vld [vmem:[#allocation9 + $0x250] sm:$0xff] }
  0x7a   : > { %1756 = vmatpush.msra.mxu3 %v1239_v56  ;;  %1697 = vmatpush.msra.mxu0 %v1190_v57  ;;  %v1270_v56 = vld [vmem:[#allocation9 + $0x2d0] sm:$0xff]  ;;  %v1033_v57 = vld [vmem:[#allocation8] sm:$0xff] }
  0x7b   : > { %1717 = vmatpush.msra.mxu1 %v1206_v58  ;;  %1737 = vmatpush.msra.mxu2 %v1222_v59  ;;  %v1287_v58 = vld [vmem:[#allocation9 + $0x358] sm:$0xff]  ;;  %1065 = vst [vmem:[#allocation1] ss:$2 sm:$0xff] %v1033_v57  ;;  %v1042_v57 = vld [vmem:[#allocation8 + $0x48] sm:$0xff] }
  0x7c   : > { %1757 = vmatpush.msra.mxu3 %v1238_v60  ;;  %1698 = vmatpush.msra.mxu0 %v1189_v61  ;;  %v1303_v59 = vld [vmem:[#allocation9 + $0x3d8] sm:$0xff]  ;;  %v1253_v60 = vld [vmem:[#allocation9 + $0x248] sm:$0xff] }
  0x7d   : > { %1718 = vmatpush.msra.mxu1 %v1205_v62  ;;  %1738 = vmatpush.msra.mxu2 %v1221_v63  ;;  %v1269_v61 = vld [vmem:[#allocation9 + $0x2c8] sm:$0xff]  ;;  %v1286_v62 = vld [vmem:[#allocation9 + $0x350] sm:$0xff] }
  0x7e   : > { %1758 = vmatpush.msra.mxu3 %v1237_v0  ;;  %1699 = vmatpush.msra.mxu0 %v1188_v1  ;;  %v1302_v63 = vld [vmem:[#allocation9 + $0x3d0] sm:$0xff]  ;;  %v1252_v0 = vld [vmem:[#allocation9 + $0x240] sm:$0xff] }
  0x7f   : > { %1719 = vmatpush.msra.mxu1 %v1204_v2  ;;  %1739 = vmatpush.msra.mxu2 %v1220_v3  ;;  %v1268_v1 = vld [vmem:[#allocation9 + $0x2c0] sm:$0xff]  ;;  %v1251_v2 = vld [vmem:[#allocation9 + $0x238] sm:$0xff]  ;;  %v1285_v3 = vld [vmem:[#allocation9 + $0x348] sm:$0xff] }
  0x80   : > { %1759 = vmatpush.msra.mxu3 %v1236_v4  ;;  %1700 = vmatpush.msra.mxu0 %v1187_v5  ;;  %v1301_v4 = vld [vmem:[#allocation9 + $0x3c8] sm:$0xff]  ;;  %v1267_v5 = vld [vmem:[#allocation9 + $0x2b8] sm:$0xff] }
  0x81   : > { %1720 = vmatpush.msra.mxu1 %v1203_v6  ;;  %1740 = vmatpush.msra.mxu2 %v1219_v7  ;;  %v1250_v6 = vld [vmem:[#allocation9 + $0x230] sm:$0xff]  ;;  %v1034_v7 = vld [vmem:[#allocation8 + $0x8] sm:$0xff] }
  0x82   : > { %1760 = vmatpush.msra.mxu3 %v1235_v8  ;;  %1701 = vmatpush.msra.mxu0 %v1186_v9  ;;  %v1266_v8 = vld [vmem:[#allocation9 + $0x2b0] sm:$0xff]  ;;  %v1284_v9 = vld [vmem:[#allocation9 + $0x340] sm:$0xff]  ;;  %1067 = vst [vmem:[#allocation1 + $0x10] ss:$2 sm:$0xff] %v1034_v7 }
  0x83   : > { %1721 = vmatpush.msra.mxu1 %v1202_v10  ;;  %1741 = vmatpush.msra.mxu2 %v1218_v11  ;;  %v1300_v10 = vld [vmem:[#allocation9 + $0x3c0] sm:$0xff]  ;;  %v1283_v11 = vld [vmem:[#allocation9 + $0x338] sm:$0xff] }
  0x84   : > { %1761 = vmatpush.msra.mxu3 %v1234_v12  ;;  %1702 = vmatpush.msra.mxu0 %v1185_v13  ;;  %v1299_v12 = vld [vmem:[#allocation9 + $0x3b8] sm:$0xff]  ;;  %v1037_v13 = vld [vmem:[#allocation8 + $0x20] sm:$0xff] }
  0x85   : > { %1722 = vmatpush.msra.mxu1 %v1201_v14  ;;  %1742 = vmatpush.msra.mxu2 %v1217_v15  ;;  %v3055_v14 = vld.sshfl [vmem:[#allocation1] sm:$0xff pattern:$0x75316420]  ;;  %v3057_v15 = vld.sshfl [vmem:[#allocation1 + $0x8] sm:$0xff pattern:$0x75316420] }
  0x86   : > { %1762 = vmatpush.msra.mxu3 %v1233_v16  ;;  %1703 = vmatpush.msra.mxu0 %v1184_v17  ;;  %v1249_v16 = vld [vmem:[#allocation9 + $0x228] sm:$0xff]  ;;  %1080 = vst [vmem:[#allocation1] ss:$2 sm:$0xff] %v1037_v13 }
  0x87   : > { %1723 = vmatpush.msra.mxu1 %v1200_v18  ;;  %1743 = vmatpush.msra.mxu2 %v1216_v19  ;;  %v1265_v17 = vld [vmem:[#allocation9 + $0x2a8] sm:$0xff]  ;;  %v1282_v18 = vld [vmem:[#allocation9 + $0x330] sm:$0xff] }
  0x88   : > { %1763 = vmatpush.msra.mxu3 %v1232_v20  ;;  %1704 = vmatpush.msra.mxu0 %v1183_v21  ;;  %v1298_v19 = vld [vmem:[#allocation9 + $0x3b0] sm:$0xff]  ;;  %v1248_v21 = vld [vmem:[#allocation9 + $0x220] sm:$0xff] }
  0x89   : > { %1724 = vmatpush.msra.mxu1 %v1199_v22  ;;  %1744 = vmatpush.msra.mxu2 %v1215_v23  ;;  %v1035_v20 = vld [vmem:[#allocation8 + $0x10] sm:$0xff]  ;;  %v1264_v22 = vld [vmem:[#allocation9 + $0x2a0] sm:$0xff]  ;;  %v1247_v23 = vld [vmem:[#allocation9 + $0x218] sm:$0xff] }
  0x8a   : > { %1764 = vmatpush.msra.mxu3 %v1231_v24  ;;  %1705 = vmatpush.msra.mxu0 %v1182_v25  ;;  %1069 = vst [vmem:[#allocation1 + $0x20] ss:$2 sm:$0xff] %v1035_v20  ;;  %v1263_v24 = vld [vmem:[#allocation9 + $0x298] sm:$0xff]  ;;  %v1281_v25 = vld [vmem:[#allocation9 + $0x328] sm:$0xff]  ;;  %v1338_v20 = vld [vmem:[#allocation9 + $0x4f0] sm:$0xff] }
  0x8b   : > { %1725 = vmatpush.msra.mxu1 %v1198_v26  ;;  %1745 = vmatpush.msra.mxu2 %v1214_v27  ;;  %v1297_v26 = vld [vmem:[#allocation9 + $0x3a8] sm:$0xff]  ;;  %v1246_v27 = vld [vmem:[#allocation9 + $0x210] sm:$0xff] }
  0x8c   : > { %1765 = vmatpush.msra.mxu3 %v1230_v28  ;;  %1706 = vmatpush.msra.mxu0 %v1181_v29  ;;  %v1280_v28 = vld [vmem:[#allocation9 + $0x320] sm:$0xff] }
  0x8d   : > { %1726 = vmatpush.msra.mxu1 %v1197_v30  ;;  %1746 = vmatpush.msra.mxu2 %v1213_v31  ;;  %v3059_v29 = vld.sshfl [vmem:[#allocation1 + $0x10] sm:$0xff pattern:$0x75316420] }
  0x8e   : > { %1766 = vmatpush.msra.mxu3 %v1229_v32  ;;  %1707 = vmatpush.msra.mxu0 %v1180_v33  ;;  %v1296_v30 = vld [vmem:[#allocation9 + $0x3a0] sm:$0xff]  ;;  %v1038_v31 = vld [vmem:[#allocation8 + $0x28] sm:$0xff]  ;;  %v1262_v33 = vld [vmem:[#allocation9 + $0x290] sm:$0xff] }
  0x8f   : > { %1727 = vmatpush.msra.mxu1 %v1196_v34  ;;  %1747 = vmatpush.msra.mxu2 %v1212_v37  ;;  %v3061_v32 = vld.sshfl [vmem:[#allocation1 + $0x18] sm:$0xff pattern:$0x75316420]  ;;  %v1295_v37 = vld [vmem:[#allocation9 + $0x398] sm:$0xff] }
  0x90   : > { %1772 = vmatpush.msrb.mxu0 %v1259_v35  ;;  %1767 = vmatpush.msra.mxu3 %v1228_v38  ;;  %v1245_v34 = vld [vmem:[#allocation9 + $0x208] sm:$0xff]  ;;  %1081 = vst [vmem:[#allocation1 + $0x10] ss:$2 sm:$0xff] %v1038_v31  ;;  %v1039_v38 = vld [vmem:[#allocation8 + $0x30] sm:$0xff] }
  0x91   : > { %1792 = vmatpush.msrb.mxu1 %v1275_v36  ;;  %1812 = vmatpush.msrb.mxu2 %v1291_v41  ;;  %v1261_v35 = vld [vmem:[#allocation9 + $0x288] sm:$0xff]  ;;  %v1279_v36 = vld [vmem:[#allocation9 + $0x318] sm:$0xff] }
  0x92   : > { %1773 = vmatpush.msrb.mxu0 %v1258_v39  ;;  %1832 = vmatpush.msrb.mxu3 %v1307_v42  ;;  %v1278_v39 = vld [vmem:[#allocation9 + $0x310] sm:$0xff]  ;;  %v1036_v41 = vld [vmem:[#allocation8 + $0x18] sm:$0xff] }
  0x93   : > { %1793 = vmatpush.msrb.mxu1 %v1274_v40  ;;  %1813 = vmatpush.msrb.mxu2 %v1290_v45  ;;  %v1294_v40 = vld [vmem:[#allocation9 + $0x390] sm:$0xff]  ;;  %v1260_v45 = vld [vmem:[#allocation9 + $0x280] sm:$0xff]  ;;  %1071 = vst [vmem:[#allocation1 + $0x30] ss:$2 sm:$0xff] %v1036_v41 }
  0x94   : > { %1774 = vmatpush.msrb.mxu0 %v1257_v43  ;;  %1833 = vmatpush.msrb.mxu3 %v1306_v46  ;;  %v3063_v42 = vld.sshfl [vmem:[#allocation1 + $0x20] sm:$0xff pattern:$0x75316420]  ;;  %v3065_v43 = vld.sshfl [vmem:[#allocation1 + $0x28] sm:$0xff pattern:$0x75316420] }
  0x95   : > { %1794 = vmatpush.msrb.mxu1 %v1273_v44  ;;  %1814 = vmatpush.msrb.mxu2 %v1289_v49  ;;  %v1244_v44 = vld [vmem:[#allocation9 + $0x200] sm:$0xff]  ;;  %1082 = vst [vmem:[#allocation1 + $0x20] ss:$2 sm:$0xff] %v1039_v38  ;;  %v1277_v46 = vld [vmem:[#allocation9 + $0x308] sm:$0xff]  ;;  %v1355_v38 = vld [vmem:[#allocation9 + $0x578] sm:$0xff] }
  0x96   : > { %1775 = vmatpush.msrb.mxu0 %v1256_v47  ;;  %1834 = vmatpush.msrb.mxu3 %v1305_v50  ;;  %v1293_v47 = vld [vmem:[#allocation9 + $0x388] sm:$0xff]  ;;  %v1292_v49 = vld [vmem:[#allocation9 + $0x380] sm:$0xff]  ;;  %v3067_v50 = vld.sshfl [vmem:[#allocation1] sm:$0xff pattern:$0x75316420] }
  0x97   : > { %1795 = vmatpush.msrb.mxu1 %v1272_v48  ;;  %1815 = vmatpush.msrb.mxu2 %v1288_v53  ;;  %v1276_v48 = vld [vmem:[#allocation9 + $0x300] sm:$0xff]  ;;  %v1040_v53 = vld [vmem:[#allocation8 + $0x38] sm:$0xff] }
  0x98   : > { %1776 = vmatpush.msrb.mxu0 %v1255_v51  ;;  %1835 = vmatpush.msrb.mxu3 %v1304_v54  ;;  %v1041_v51 = vld [vmem:[#allocation8 + $0x40] sm:$0xff] }
  0x99   : > { %1796 = vmatpush.msrb.mxu1 %v1271_v52  ;;  %1816 = vmatpush.msrb.mxu2 %v1287_v58  ;;  %v3069_v52 = vld.sshfl [vmem:[#allocation1 + $0x8] sm:$0xff pattern:$0x75316420]  ;;  %v3077_v58 = vld.sshfl [vmem:[#allocation1 + $0x18] sm:$0xff pattern:$0x75316420] }
  0x9a   : > { %1777 = vmatpush.msrb.mxu0 %v1254_v55  ;;  %1836 = vmatpush.msrb.mxu3 %v1303_v59  ;;  %1092 = vst [vmem:[#allocation1] ss:$2 sm:$0xff] %v1041_v51  ;;  %v3071_v54 = vld.sshfl [vmem:[#allocation1 + $0x30] sm:$0xff pattern:$0x75316420]  ;;  %v1043_v59 = vld [vmem:[#allocation8 + $0x50] sm:$0xff] }
  0x9b   : > { %1797 = vmatpush.msrb.mxu1 %v1270_v56  ;;  %1817 = vmatpush.msrb.mxu2 %v1286_v62  ;;  %v3073_v55 = vld.sshfl [vmem:[#allocation1 + $0x38] sm:$0xff pattern:$0x75316420]  ;;  %v3075_v56 = vld.sshfl [vmem:[#allocation1 + $0x10] sm:$0xff pattern:$0x75316420] }
  0x9c   : > { %1778 = vmatpush.msrb.mxu0 %v1253_v60  ;;  %1837 = vmatpush.msrb.mxu3 %v1302_v63  ;;  %1083 = vst [vmem:[#allocation1 + $0x30] ss:$2 sm:$0xff] %v1040_v53  ;;  %v3079_v60 = vld.sshfl [vmem:[#allocation1 + $0x20] sm:$0xff pattern:$0x75316420] }
  0x9d   : > { %1798 = vmatpush.msrb.mxu1 %v1269_v61  ;;  %1818 = vmatpush.msrb.mxu2 %v1285_v3  ;;  %1093 = vst [vmem:[#allocation1 + $0x10] ss:$2 sm:$0xff] %v1042_v57  ;;  %v3081_v61 = vld.sshfl [vmem:[#allocation1 + $0x28] sm:$0xff pattern:$0x75316420]  ;;  %v1354_v53 = vld [vmem:[#allocation9 + $0x570] sm:$0xff] }
  0x9e   : > { %1779 = vmatpush.msrb.mxu0 %v1252_v0  ;;  %1838 = vmatpush.msrb.mxu3 %v1301_v4  ;;  %1094 = vst [vmem:[#allocation1 + $0x20] ss:$2 sm:$0xff] %v1043_v59  ;;  %v1335_v51 = vld [vmem:[#allocation9 + $0x4d8] sm:$0xff]  ;;  %v1370_v57 = vld [vmem:[#allocation9 + $0x5f0] sm:$0xff] }
  0x9f   : > { %1799 = vmatpush.msrb.mxu1 %v1268_v1  ;;  %1819 = vmatpush.msrb.mxu2 %v1284_v9 }
  0xa0   : > { %1780 = vmatpush.msrb.mxu0 %v1251_v2  ;;  %1839 = vmatpush.msrb.mxu3 %v1300_v10  ;;  %v1323_v10 = vld [vmem:[#allocation9 + $0x478] sm:$0xff] }
  0xa1   : > { %1800 = vmatpush.msrb.mxu1 %v1267_v5  ;;  %1820 = vmatpush.msrb.mxu2 %v1283_v11  ;;  %v1339_v11 = vld [vmem:[#allocation9 + $0x4f8] sm:$0xff] }
  0xa2   : > { %1781 = vmatpush.msrb.mxu0 %v1250_v6  ;;  %1840 = vmatpush.msrb.mxu3 %v1299_v12  ;;  %v1044_v6 = vld [vmem:[#allocation8 + $0x58] sm:$0xff]  ;;  %v1045_v12 = vld [vmem:[#allocation8 + $0x60] sm:$0xff] }
  0xa3   : > { %1801 = vmatpush.msrb.mxu1 %v1266_v8  ;;  %1821 = vmatpush.msrb.mxu2 %v1282_v18  ;;  %v3087_v5 = vld.sshfl [vmem:[#allocation1 + $0x30] sm:$0xff pattern:$0x75316420]  ;;  %v3089_v7 = vld.sshfl [vmem:[#allocation1 + $0x38] sm:$0xff pattern:$0x75316420] }
  0xa4   : > { %1782 = vmatpush.msrb.mxu0 %v1249_v16  ;;  %1841 = vmatpush.msrb.mxu3 %v1298_v19  ;;  %1095 = vst [vmem:[#allocation1 + $0x30] ss:$2 sm:$0xff] %v1044_v6  ;;  %v3093_v13 = vld.sshfl [vmem:[#allocation1] sm:$0xff pattern:$0x75316420]  ;;  %v1369_v6 = vld [vmem:[#allocation9 + $0x5e8] sm:$0xff] }
  0xa5   : > { %1802 = vmatpush.msrb.mxu1 %v1265_v17  ;;  %1822 = vmatpush.msrb.mxu2 %v1281_v25  ;;  %v3095_v16 = vld.sshfl [vmem:[#allocation1 + $0x8] sm:$0xff pattern:$0x75316420]  ;;  %v1322_v19 = vld [vmem:[#allocation9 + $0x470] sm:$0xff]  ;;  %v1321_v25 = vld [vmem:[#allocation9 + $0x468] sm:$0xff] }
  0xa6   : > { %1783 = vmatpush.msrb.mxu0 %v1248_v21  ;;  %1842 = vmatpush.msrb.mxu3 %v1297_v26  ;;  %1104 = vst [vmem:[#allocation1] ss:$2 sm:$0xff] %v1045_v12  ;;  %v1337_v26 = vld [vmem:[#allocation9 + $0x4e8] sm:$0xff]  ;;  %v1352_v12 = vld [vmem:[#allocation9 + $0x560] sm:$0xff] }
  0xa7   : > { %1803 = vmatpush.msrb.mxu1 %v1264_v22  ;;  %1823 = vmatpush.msrb.mxu2 %v1280_v28 }
  0xa8   : > { %1784 = vmatpush.msrb.mxu0 %v1247_v23  ;;  %1843 = vmatpush.msrb.mxu3 %v1296_v30  ;;  %v1320_v30 = vld [vmem:[#allocation9 + $0x460] sm:$0xff] }
  0xa9   : > { %1804 = vmatpush.msrb.mxu1 %v1263_v24  ;;  %1824 = vmatpush.msrb.mxu2 %v1279_v36 }
  0xaa   : > { %1785 = vmatpush.msrb.mxu0 %v1246_v27  ;;  %1844 = vmatpush.msrb.mxu3 %v1295_v37 }
  0xab   : > { %1805 = vmatpush.msrb.mxu1 %v1262_v33  ;;  %1825 = vmatpush.msrb.mxu2 %v1278_v39  ;;  %v1046_v39 = vld [vmem:[#allocation8 + $0x68] sm:$0xff] }
  0xac   : > { %1786 = vmatpush.msrb.mxu0 %v1245_v34  ;;  %1845 = vmatpush.msrb.mxu3 %v1294_v40  ;;  %v1336_v34 = vld [vmem:[#allocation9 + $0x4e0] sm:$0xff]  ;;  %v3105_v40 = vld.sshfl [vmem:[#allocation1 + $0x18] sm:$0xff pattern:$0x75316420] }
  0xad   : > { %1806 = vmatpush.msrb.mxu1 %v1261_v35  ;;  %1826 = vmatpush.msrb.mxu2 %v1277_v46  ;;  %v3101_v35 = vld.sshfl [vmem:[#allocation1 + $0x10] sm:$0xff pattern:$0x75316420]  ;;  %v3109_v46 = vld.sshfl [vmem:[#allocation1 + $0x20] sm:$0xff pattern:$0x75316420] }
  0xae   : > { %1787 = vmatpush.msrb.mxu0 %v1244_v44  ;;  %1846 = vmatpush.msrb.mxu3 %v1293_v47  ;;  %1105 = vst [vmem:[#allocation1 + $0x10] ss:$2 sm:$0xff] %v1046_v39  ;;  %v1047_v47 = vld [vmem:[#allocation8 + $0x70] sm:$0xff]  ;;  %v1365_v39 = vld [vmem:[#allocation9 + $0x5c8] sm:$0xff] }
  0xaf   : > { %1807 = vmatpush.msrb.mxu1 %v1260_v45  ;;  %1827 = vmatpush.msrb.mxu2 %v1276_v48  ;;  %v1371_v45 = vld [vmem:[#allocation9 + $0x5f8] sm:$0xff] }
  0xb0   : > { %1847 = vmatpush.msrb.mxu3 %v1292_v49  ;;  %v1319_v49 = vld [vmem:[#allocation9 + $0x458] sm:$0xff] }
  0xb2   : > { %v3083_v62 = vpop.permute.xlu0 %354 }
  0xb9   : > { %v378_v63 = vpop.f32.mrf.mxu0 }
  0xba   : > { %v398_v0 = vpop.f32.mrf.mxu1  ;;  %v379_v1 = vadd.f32 %v378_v63, %v3083_v62 }
  0xbb   : > { %v399_v2 = vadd.f32 %v398_v0, %v3083_v62  ;;  %v1318_v0 = vld [vmem:[#allocation9 + $0x450] sm:$0xff] }
  0xbc   : > { %v1001_v3 = vmax.f32 %v379_v1, 0.0  ;;  %v1334_v1 = vld [vmem:[#allocation9 + $0x4d0] sm:$0xff] }
  0xbd   : > { %v1002_v4 = vmax.f32 %v399_v2, 0.0 }
  0xbe   : > { %v1148_v8 = vmul.f32 %v3055_v14, %v1001_v3 }
  0xbf   : > { %v1149_v9 = vmul.f32 %v3057_v15, %v1002_v4  ;;  %v1353_v4 = vld [vmem:[#allocation9 + $0x568] sm:$0xff] }
  0xc0   : > { %v418_v17 = vpop.f32.mrf.mxu2  ;;  %1708 = vmatmul.f32.vlgmr.msra.gmra.mxu0 %v1148_v8  ;;  %v1317_v8 = vld [vmem:[#allocation9 + $0x448] sm:$0xff] }
  0xc1   : > { %v438_v18 = vpop.f32.mrf.mxu3  ;;  %1728 = vmatmul.f32.vlgmr.msra.gmra.mxu1 %v1149_v9  ;;  %v419_v21 = vadd.f32 %v418_v17, %v3083_v62  ;;  %1852 = vmatpush.msra.mxu0 %v1323_v10  ;;  %v458_v15 = vpop.f32.mrf.mxu0  ;;  %v1333_v9 = vld [vmem:[#allocation9 + $0x4c8] sm:$0xff]  ;;  %v1368_v17 = vld [vmem:[#allocation9 + $0x5e0] sm:$0xff] }
  0xc2   : > { %v439_v14 = vadd.f32 %v438_v18, %v3083_v62  ;;  %1872 = vmatpush.msra.mxu1 %v1339_v11  ;;  %v478_v22 = vpop.f32.mrf.mxu1  ;;  %v459_v23 = vadd.f32 %v458_v15, %v3083_v62  ;;  %v1048_v18 = vld [vmem:[#allocation8 + $0x78] sm:$0xff] }
  0xc3   : > { %v479_v24 = vadd.f32 %v478_v22, %v3083_v62  ;;  %v1003_v27 = vmax.f32 %v419_v21, 0.0  ;;  %1853 = vmatpush.msra.mxu0 %v1322_v19  ;;  %v3121_v19 = vld.sshfl [vmem:[#allocation1 + $0x30] sm:$0xff pattern:$0x75316420] }
  0xc4   : > { %v1004_v28 = vmax.f32 %v439_v14, 0.0  ;;  %1873 = vmatpush.msra.mxu1 %v1338_v20  ;;  %v1005_v31 = vmax.f32 %v459_v23, 0.0  ;;  %v3123_v20 = vld.sshfl [vmem:[#allocation1 + $0x38] sm:$0xff pattern:$0x75316420]  ;;  %v1316_v21 = vld [vmem:[#allocation9 + $0x440] sm:$0xff] }
  0xc5   : > { %v1006_v33 = vmax.f32 %v479_v24, 0.0  ;;  %v1150_v36 = vmul.f32 %v3059_v29, %v1003_v27  ;;  %1854 = vmatpush.msra.mxu0 %v1321_v25  ;;  %v3111_v29 = vld.sshfl [vmem:[#allocation1 + $0x28] sm:$0xff pattern:$0x75316420]  ;;  %1107 = vst [vmem:[#allocation1 + $0x30] ss:$2 sm:$0xff] %v1048_v18 }
  0xc6   : > { %v1151_v37 = vmul.f32 %v3061_v32, %v1004_v28  ;;  %1874 = vmatpush.msra.mxu1 %v1337_v26  ;;  %v1152_v41 = vmul.f32 %v3063_v42, %v1005_v31  ;;  %1106 = vst [vmem:[#allocation1 + $0x20] ss:$2 sm:$0xff] %v1047_v47  ;;  %v1332_v14 = vld [vmem:[#allocation9 + $0x4c0] sm:$0xff]  ;;  %v1315_v23 = vld [vmem:[#allocation9 + $0x438] sm:$0xff]  ;;  %v1350_v27 = vld [vmem:[#allocation9 + $0x550] sm:$0xff] }
  0xc7   : > { %v1153_v44 = vmul.f32 %v3065_v43, %v1006_v33  ;;  %1748 = vmatmul.f32.vlgmr.msra.gmra.mxu2 %v1150_v36  ;;  %1855 = vmatpush.msra.mxu0 %v1320_v30  ;;  %v1331_v24 = vld [vmem:[#allocation9 + $0x4b8] sm:$0xff]  ;;  %v1366_v28 = vld [vmem:[#allocation9 + $0x5d0] sm:$0xff] }
  0xc8   : > { %1768 = vmatmul.f32.vlgmr.msra.gmra.mxu3 %v1151_v37  ;;  %1875 = vmatpush.msra.mxu1 %v1336_v34  ;;  %v498_v32 = vpop.f32.mrf.mxu2  ;;  %v1314_v33 = vld [vmem:[#allocation9 + $0x430] sm:$0xff] }
  0xc9   : > { %v518_v48 = vpop.f32.mrf.mxu3  ;;  %1892 = vmatpush.msra.mxu2 %v1355_v38  ;;  %1912 = vmatpush.msra.mxu3 %v1371_v45  ;;  %v499_v42 = vadd.f32 %v498_v32, %v3083_v62  ;;  %v3115_v59 = vpop.f32.mrf.mxu0  ;;  %v1330_v34 = vld [vmem:[#allocation9 + $0x4b0] sm:$0xff]  ;;  %v1349_v38 = vld [vmem:[#allocation9 + $0x548] sm:$0xff]  ;;  %v1348_v32 = vld [vmem:[#allocation9 + $0x540] sm:$0xff] }
  0xca   : > { %v519_v43 = vadd.f32 %v518_v48, %v3083_v62  ;;  %v3117_v63 = vpop.f32.mrf.mxu1  ;;  %1788 = vmatmul.f32.vlgmr.msrb.gmra.mxu0 %v1152_v41  ;;  %1808 = vmatmul.f32.vlgmr.msrb.gmra.mxu1 %v1153_v44  ;;  %v1313_v41 = vld [vmem:[#allocation9 + $0x428] sm:$0xff]  ;;  %v1364_v48 = vld [vmem:[#allocation9 + $0x5c0] sm:$0xff]  ;;  %v1326_v18 = vld [vmem:[#allocation9 + $0x490] sm:$0xff] }
  0xcb   : > { %v1007_v2 = vmax.f32 %v499_v42, 0.0  ;;  %1856 = vmatpush.msra.mxu0 %v1319_v49  ;;  %1876 = vmatpush.msra.mxu1 %v1335_v51  ;;  %v1329_v44 = vld [vmem:[#allocation9 + $0x4a8] sm:$0xff]  ;;  %v1312_v49 = vld [vmem:[#allocation9 + $0x420] sm:$0xff]  ;;  %v539_v42 = vadd.f32 %v3115_v59, %v3083_v62  ;;  %v1346_v59 = vld [vmem:[#allocation9 + $0x530] sm:$0xff] }
  0xcc   : > { %v1008_v3 = vmax.f32 %v519_v43, 0.0  ;;  %1893 = vmatpush.msra.mxu2 %v1354_v53  ;;  %1913 = vmatpush.msra.mxu3 %v1370_v57  ;;  %v1328_v51 = vld [vmem:[#allocation9 + $0x4a0] sm:$0xff]  ;;  %v1347_v43 = vld [vmem:[#allocation9 + $0x538] sm:$0xff] }
  0xcd   : > { %v1154_v10 = vmul.f32 %v3071_v54, %v1007_v2  ;;  %1857 = vmatpush.msra.mxu0 %v1318_v0  ;;  %1877 = vmatpush.msra.mxu1 %v1334_v1  ;;  %v1351_v54 = vld [vmem:[#allocation9 + $0x558] sm:$0xff] }
  0xce   : > { %v1155_v11 = vmul.f32 %v3073_v55, %v1008_v3  ;;  %1894 = vmatpush.msra.mxu2 %v1353_v4  ;;  %1914 = vmatpush.msra.mxu3 %v1369_v6  ;;  %v1367_v55 = vld [vmem:[#allocation9 + $0x5d8] sm:$0xff]  ;;  %v559_v6 = vadd.f32 %v3117_v63, %v3083_v62  ;;  %v1345_v63 = vld [vmem:[#allocation9 + $0x528] sm:$0xff] }
  0xcf   : > { %1858 = vmatpush.msra.mxu0 %v1317_v8  ;;  %1878 = vmatpush.msra.mxu1 %v1333_v9  ;;  %v1363_v53 = vld [vmem:[#allocation9 + $0x5b8] sm:$0xff]  ;;  %v1362_v8 = vld [vmem:[#allocation9 + $0x5b0] sm:$0xff] }
  0xd0   : > { %1895 = vmatpush.msra.mxu2 %v1352_v12  ;;  %1915 = vmatpush.msra.mxu3 %v1368_v17  ;;  %v3125_v15 = vpop.f32.mrf.mxu2  ;;  %v1311_v1 = vld [vmem:[#allocation9 + $0x418] sm:$0xff]  ;;  %v1310_v17 = vld [vmem:[#allocation9 + $0x410] sm:$0xff] }
  0xd1   : > { %v3127_v22 = vpop.f32.mrf.mxu3  ;;  %1828 = vmatmul.f32.vlgmr.msrb.gmra.mxu2 %v1154_v10  ;;  %1848 = vmatmul.f32.vlgmr.msrb.gmra.mxu3 %v1155_v11  ;;  %v618_v25 = vpop.f32.mrf.mxu0  ;;  %v1327_v2 = vld [vmem:[#allocation9 + $0x498] sm:$0xff] }
  0xd2   : > { %v638_v26 = vpop.f32.mrf.mxu1  ;;  %1859 = vmatpush.msra.mxu0 %v1316_v21  ;;  %1879 = vmatpush.msra.mxu1 %v1332_v14  ;;  %v619_v30 = vadd.f32 %v618_v25, %v3083_v62  ;;  %v1009_v21 = vmax.f32 %v539_v42, 0.0  ;;  %v1309_v25 = vld [vmem:[#allocation9 + $0x408] sm:$0xff] }
  0xd3   : > { %v639_v31 = vadd.f32 %v638_v26, %v3083_v62  ;;  %1896 = vmatpush.msra.mxu2 %v1351_v54  ;;  %1916 = vmatpush.msra.mxu3 %v1367_v55  ;;  %v1361_v55 = vld [vmem:[#allocation9 + $0x5a8] sm:$0xff] }
  0xd4   : > { %1860 = vmatpush.msra.mxu0 %v1315_v23  ;;  %1880 = vmatpush.msra.mxu1 %v1331_v24  ;;  %v1013_v36 = vmax.f32 %v619_v30, 0.0  ;;  %v1325_v26 = vld [vmem:[#allocation9 + $0x488] sm:$0xff] }
  0xd5   : > { %v1014_v37 = vmax.f32 %v639_v31, 0.0  ;;  %1897 = vmatpush.msra.mxu2 %v1350_v27  ;;  %1917 = vmatpush.msra.mxu3 %v1366_v28  ;;  %v1010_v27 = vmax.f32 %v559_v6, 0.0  ;;  %v1344_v31 = vld [vmem:[#allocation9 + $0x520] sm:$0xff]  ;;  %v1341_v6 = vld [vmem:[#allocation9 + $0x508] sm:$0xff] }
  0xd6   : > { %v3132_v45 = vmul.f32 %v3079_v60, %v1013_v36  ;;  %1861 = vmatpush.msra.mxu0 %v1314_v33  ;;  %1881 = vmatpush.msra.mxu1 %v1330_v34  ;;  %v1360_v33 = vld [vmem:[#allocation9 + $0x5a0] sm:$0xff]  ;;  %v1156_v34 = vmul.f32 %v3067_v50, %v1009_v21  ;;  %v579_v36 = vadd.f32 %v3125_v15, %v3083_v62  ;;  %v1387_v15 = vld [vmem:[#allocation9 + $0x678] sm:$0xff] }
  0xd7   : > { %v3135_v47 = vmul.f32 %v3081_v61, %v1014_v37  ;;  %1898 = vmatpush.msra.mxu2 %v1349_v38  ;;  %1918 = vmatpush.msra.mxu3 %v1365_v39  ;;  %v1359_v37 = vld [vmem:[#allocation9 + $0x598] sm:$0xff]  ;;  %v599_v39 = vadd.f32 %v3127_v22, %v3083_v62 }
  0xd8   : > { %1862 = vmatpush.msra.mxu0 %v1313_v41  ;;  %1882 = vmatpush.msra.mxu1 %v1329_v44  ;;  %v658_v60 = vpop.f32.mrf.mxu2 }
  0xd9   : > { %v678_v57 = vpop.f32.mrf.mxu3  ;;  %1899 = vmatpush.msra.mxu2 %v1348_v32  ;;  %1919 = vmatpush.msra.mxu3 %v1364_v48  ;;  %v659_v61 = vadd.f32 %v658_v60, %v3083_v62  ;;  %v698_v3 = vpop.f32.mrf.mxu0  ;;  %v1157_v48 = vmul.f32 %v3069_v52, %v1010_v27  ;;  %v1358_v60 = vld [vmem:[#allocation9 + $0x590] sm:$0xff]  ;;  %v1399_v27 = vld [vmem:[#allocation9 + $0x6d8] sm:$0xff] }
  0xda   : > { %v679_v0 = vadd.f32 %v678_v57, %v3083_v62  ;;  %v718_v4 = vpop.f32.mrf.mxu1  ;;  %1863 = vmatpush.msra.mxu0 %v1312_v49  ;;  %1883 = vmatpush.msra.mxu1 %v1328_v51  ;;  %v699_v9 = vadd.f32 %v698_v3, %v3083_v62  ;;  %v1403_v49 = vld [vmem:[#allocation9 + $0x6f8] sm:$0xff]  ;;  %v1011_v57 = vmax.f32 %v579_v36, 0.0  ;;  %v1386_v52 = vld [vmem:[#allocation9 + $0x670] sm:$0xff]  ;;  %v1417_v36 = vld [vmem:[#allocation9 + $0x768] sm:$0xff] }
  0xdb   : > { %v719_v10 = vadd.f32 %v718_v4, %v3083_v62  ;;  %1900 = vmatpush.msra.mxu2 %v1347_v43  ;;  %1920 = vmatpush.msra.mxu3 %v1363_v53  ;;  %v1015_v11 = vmax.f32 %v659_v61, 0.0  ;;  %v1342_v53 = vld [vmem:[#allocation9 + $0x510] sm:$0xff] }
  0xdc   : > { %v1016_v12 = vmax.f32 %v679_v0, 0.0  ;;  %1864 = vmatpush.msra.mxu0 %v1311_v1  ;;  %1884 = vmatpush.msra.mxu1 %v1327_v2  ;;  %v1017_v14 = vmax.f32 %v699_v9, 0.0  ;;  %v1402_v1 = vld [vmem:[#allocation9 + $0x6f0] sm:$0xff]  ;;  %v1012_v2 = vmax.f32 %v599_v39, 0.0  ;;  %v1432_v39 = vld [vmem:[#allocation9 + $0x7e0] sm:$0xff] }
  0xdd   : > { %v1018_v54 = vmax.f32 %v719_v10, 0.0  ;;  %v3146_v23 = vmul.f32 %v3087_v5, %v1015_v11  ;;  %1901 = vmatpush.msra.mxu2 %v1346_v59  ;;  %1921 = vmatpush.msra.mxu3 %v1362_v8  ;;  %v1308_v5 = vld [vmem:[#allocation9 + $0x400] sm:$0xff]  ;;  %v1357_v59 = vld [vmem:[#allocation9 + $0x588] sm:$0xff] }
  0xde   : > { %v3149_v24 = vmul.f32 %v3089_v7, %v1016_v12  ;;  %v3152_v28 = vmul.f32 %v3093_v13, %v1017_v14  ;;  %1865 = vmatpush.msra.mxu0 %v1310_v17  ;;  %1885 = vmatpush.msra.mxu1 %v1326_v18  ;;  %v1324_v7 = vld [vmem:[#allocation9 + $0x480] sm:$0xff]  ;;  %v1343_v13 = vld [vmem:[#allocation9 + $0x518] sm:$0xff]  ;;  %v1385_v10 = vld [vmem:[#allocation9 + $0x668] sm:$0xff]  ;;  %v1159_v21 = vmul.f32 %v3077_v58, %v1012_v2 }
  0xdf   : > { %v3155_v30 = vmul.f32 %v3095_v16, %v1018_v54  ;;  %1902 = vmatpush.msra.mxu2 %v1345_v63  ;;  %1922 = vmatpush.msra.mxu3 %v1361_v55  ;;  %v1401_v11 = vld [vmem:[#allocation9 + $0x6e8] sm:$0xff]  ;;  %v1356_v12 = vld [vmem:[#allocation9 + $0x580] sm:$0xff]  ;;  %v1419_v63 = vld [vmem:[#allocation9 + $0x778] sm:$0xff] }
  0xe0   : > { %1866 = vmatpush.msra.mxu0 %v1309_v25  ;;  %1886 = vmatpush.msra.mxu1 %v1325_v26  ;;  %v738_v38 = vpop.f32.mrf.mxu2  ;;  %v1400_v14 = vld [vmem:[#allocation9 + $0x6e0] sm:$0xff]  ;;  %v1435_v55 = vld [vmem:[#allocation9 + $0x7f8] sm:$0xff]  ;;  %v1418_v58 = vld [vmem:[#allocation9 + $0x770] sm:$0xff] }
  0xe1   : > { %v758_v16 = vpop.f32.mrf.mxu3  ;;  %1903 = vmatpush.msra.mxu2 %v1344_v31  ;;  %1923 = vmatpush.msra.mxu3 %v1360_v33  ;;  %v739_v41 = vadd.f32 %v738_v38, %v3083_v62  ;;  %v778_v32 = vpop.f32.mrf.mxu0  ;;  %v1383_v26 = vld [vmem:[#allocation9 + $0x658] sm:$0xff]  ;;  %v1434_v31 = vld [vmem:[#allocation9 + $0x7f0] sm:$0xff]  ;;  %v1397_v38 = vld [vmem:[#allocation9 + $0x6c8] sm:$0xff] }
  0xe2   : > { %v759_v44 = vadd.f32 %v758_v16, %v3083_v62  ;;  %v798_v50 = vpop.f32.mrf.mxu1  ;;  %1867 = vmatpush.msra.mxu0 %v1308_v5  ;;  %1887 = vmatpush.msra.mxu1 %v1324_v7  ;;  %v779_v51 = vadd.f32 %v778_v32, %v3083_v62  ;;  %v1382_v7 = vld [vmem:[#allocation9 + $0x650] sm:$0xff]  ;;  %v1416_v16 = vld [vmem:[#allocation9 + $0x760] sm:$0xff]  ;;  %v1379_v32 = vld [vmem:[#allocation9 + $0x638] sm:$0xff] }
  0xe3   : > { %v799_v42 = vadd.f32 %v798_v50, %v3083_v62  ;;  %1904 = vmatpush.msra.mxu2 %v1343_v13  ;;  %1924 = vmatpush.msra.mxu3 %v1359_v37  ;;  %v1019_v22 = vmax.f32 %v739_v41, 0.0  ;;  %v1433_v13 = vld [vmem:[#allocation9 + $0x7e8] sm:$0xff]  ;;  %v1396_v41 = vld [vmem:[#allocation9 + $0x6c0] sm:$0xff]  ;;  %v1395_v50 = vld [vmem:[#allocation9 + $0x6b8] sm:$0xff] }
  0xe4   : > { %v1020_v43 = vmax.f32 %v759_v44, 0.0  ;;  %1868 = vmatmul.f32.vlgmr.msra.gmra.mxu0 %v1156_v34  ;;  %1888 = vmatmul.f32.vlgmr.msra.gmra.mxu1 %v1157_v48  ;;  %v1021_v61 = vmax.f32 %v779_v51, 0.0  ;;  %v1398_v34 = vld [vmem:[#allocation9 + $0x6d0] sm:$0xff]  ;;  %v1381_v37 = vld [vmem:[#allocation9 + $0x648] sm:$0xff]  ;;  %v1431_v44 = vld [vmem:[#allocation9 + $0x7d8] sm:$0xff] }
  0xe5   : > { %v1022_v0 = vmax.f32 %v799_v42, 0.0  ;;  %v3168_v3 = vmul.f32 %v3101_v35, %v1019_v22  ;;  %1932 = vmatpush.msrb.mxu0 %v1387_v15  ;;  %1952 = vmatpush.msrb.mxu1 %v1403_v49  ;;  %v1340_v35 = vld [vmem:[#allocation9 + $0x500] sm:$0xff]  ;;  %v1414_v48 = vld [vmem:[#allocation9 + $0x750] sm:$0xff]  ;;  %v1413_v42 = vld [vmem:[#allocation9 + $0x748] sm:$0xff] }
  0xe6   : > { %v3171_v4 = vmul.f32 %v3105_v40, %v1020_v43  ;;  %1905 = vmatpush.msra.mxu2 %v1342_v53  ;;  %1925 = vmatpush.msra.mxu3 %v1358_v60  ;;  %v3174_v8 = vmul.f32 %v3109_v46, %v1021_v61  ;;  %v1158_v40 = vmul.f32 %v3075_v56, %v1011_v57  ;;  %v1384_v46 = vld [vmem:[#allocation9 + $0x660] sm:$0xff]  ;;  %v1430_v15 = vld [vmem:[#allocation9 + $0x7d0] sm:$0xff]  ;;  %v1429_v22 = vld [vmem:[#allocation9 + $0x7c8] sm:$0xff] }
  0xe7   : > { %v3177_v9 = vmul.f32 %v3111_v29, %v1022_v0  ;;  %1933 = vmatpush.msrb.mxu0 %v1386_v52  ;;  %1953 = vmatpush.msrb.mxu1 %v1402_v1  ;;  %v1378_v49 = vld [vmem:[#allocation9 + $0x630] sm:$0xff]  ;;  %v1377_v43 = vld [vmem:[#allocation9 + $0x628] sm:$0xff]  ;;  %v1412_v60 = vld [vmem:[#allocation9 + $0x740] sm:$0xff] }
  0xe8   : > { %1906 = vmatpush.msra.mxu2 %v1341_v6  ;;  %1926 = vmatpush.msra.mxu3 %v1357_v59  ;;  %v818_v17 = vpop.f32.mrf.mxu2  ;;  %v1394_v51 = vld [vmem:[#allocation9 + $0x6b0] sm:$0xff]  ;;  %v1393_v53 = vld [vmem:[#allocation9 + $0x6a8] sm:$0xff]  ;;  %v1428_v57 = vld [vmem:[#allocation9 + $0x7c0] sm:$0xff] }
  0xe9   : > { %v838_v18 = vpop.f32.mrf.mxu3  ;;  %1934 = vmatpush.msrb.mxu0 %v1385_v10  ;;  %1954 = vmatpush.msrb.mxu1 %v1401_v11  ;;  %v819_v29 = vadd.f32 %v818_v17, %v3083_v62  ;;  %v1376_v61 = vld [vmem:[#allocation9 + $0x620] sm:$0xff]  ;;  %v1411_v52 = vld [vmem:[#allocation9 + $0x738] sm:$0xff]  ;;  %v1410_v59 = vld [vmem:[#allocation9 + $0x730] sm:$0xff] }
  0xea   : > { %v839_v54 = vadd.f32 %v838_v18, %v3083_v62  ;;  %1907 = vmatpush.msra.mxu2 %v1340_v35  ;;  %1927 = vmatpush.msra.mxu3 %v1356_v12  ;;  %v1392_v0 = vld [vmem:[#allocation9 + $0x6a0] sm:$0xff]  ;;  %v1427_v1 = vld [vmem:[#allocation9 + $0x7b8] sm:$0xff]  ;;  %v1426_v10 = vld [vmem:[#allocation9 + $0x7b0] sm:$0xff] }
  0xeb   : > { %1908 = vmatmul.f32.vlgmr.msra.gmra.mxu2 %v1158_v40  ;;  %1928 = vmatmul.f32.vlgmr.msra.gmra.mxu3 %v1159_v21  ;;  %v1023_v56 = vmax.f32 %v819_v29, 0.0  ;;  %v1375_v2 = vld [vmem:[#allocation9 + $0x618] sm:$0xff]  ;;  %v1374_v11 = vld [vmem:[#allocation9 + $0x610] sm:$0xff]  ;;  %v1409_v12 = vld [vmem:[#allocation9 + $0x728] sm:$0xff] }
  0xec   : > { %v1024_v25 = vmax.f32 %v839_v54, 0.0  ;;  %1935 = vmatpush.msrb.mxu0 %v1384_v46  ;;  %1955 = vmatpush.msrb.mxu1 %v1400_v14  ;;  %v1391_v6 = vld [vmem:[#allocation9 + $0x698] sm:$0xff]  ;;  %v1390_v35 = vld [vmem:[#allocation9 + $0x690] sm:$0xff]  ;;  %v1425_v40 = vld [vmem:[#allocation9 + $0x7a8] sm:$0xff] }
  0xed   : > { %1972 = vmatpush.msrb.mxu2 %v1419_v63  ;;  %1992 = vmatpush.msrb.mxu3 %v1435_v55  ;;  %v3184_v33 = vmul.f32 %v3121_v19, %v1023_v56  ;;  %v1380_v19 = vld [vmem:[#allocation9 + $0x640] sm:$0xff]  ;;  %v1373_v17 = vld [vmem:[#allocation9 + $0x608] sm:$0xff]  ;;  %v1407_v54 = vld [vmem:[#allocation9 + $0x718] sm:$0xff] }
  0xee   : > { %v3187_v5 = vmul.f32 %v3123_v20, %v1024_v25  ;;  %1936 = vmatpush.msrb.mxu0 %v1383_v26  ;;  %1956 = vmatpush.msrb.mxu1 %v1399_v27  ;;  %v1415_v20 = vld [vmem:[#allocation9 + $0x758] sm:$0xff]  ;;  %v1389_v18 = vld [vmem:[#allocation9 + $0x688] sm:$0xff]  ;;  %v1408_v21 = vld [vmem:[#allocation9 + $0x720] sm:$0xff] }
  0xef   : > { %1973 = vmatpush.msrb.mxu2 %v1418_v58  ;;  %1993 = vmatpush.msrb.mxu3 %v1434_v31  ;;  %v1424_v46 = vld [vmem:[#allocation9 + $0x7a0] sm:$0xff]  ;;  %v1423_v63 = vld [vmem:[#allocation9 + $0x798] sm:$0xff]  ;;  %v1406_v25 = vld [vmem:[#allocation9 + $0x710] sm:$0xff] }
  0xf0   : > { %1937 = vmatpush.msrb.mxu0 %v1382_v7  ;;  %1957 = vmatpush.msrb.mxu1 %v1398_v34  ;;  %v1372_v14 = vld [vmem:[#allocation9 + $0x600] sm:$0xff]  ;;  %v1451_v55 = vld [vmem:[#allocation9 + $0x878] sm:$0xff]  ;;  %v1422_v26 = vld [vmem:[#allocation9 + $0x790] sm:$0xff] }
  0xf1   : > { %1974 = vmatpush.msrb.mxu2 %v1417_v36  ;;  %1994 = vmatpush.msrb.mxu3 %v1433_v13  ;;  %v1388_v29 = vld [vmem:[#allocation9 + $0x680] sm:$0xff]  ;;  %v1467_v56 = vld [vmem:[#allocation9 + $0x8f8] sm:$0xff]  ;;  %v1450_v27 = vld [vmem:[#allocation9 + $0x870] sm:$0xff] }
  0xf2   : > { %1938 = vmatpush.msrb.mxu0 %v1381_v37  ;;  %1958 = vmatpush.msrb.mxu1 %v1397_v38  ;;  %v1466_v58 = vld [vmem:[#allocation9 + $0x8f0] sm:$0xff]  ;;  %v1405_v31 = vld [vmem:[#allocation9 + $0x708] sm:$0xff]  ;;  %v1404_v13 = vld [vmem:[#allocation9 + $0x700] sm:$0xff] }
  0xf3   : > { %1975 = vmatpush.msrb.mxu2 %v1416_v16  ;;  %1995 = vmatpush.msrb.mxu3 %v1432_v39  ;;  %v1421_v7 = vld [vmem:[#allocation9 + $0x788] sm:$0xff]  ;;  %v1420_v37 = vld [vmem:[#allocation9 + $0x780] sm:$0xff]  ;;  %v1483_v38 = vld [vmem:[#allocation9 + $0x978] sm:$0xff] }
  0xf4   : > { %1939 = vmatpush.msrb.mxu0 %v1380_v19  ;;  %1959 = vmatpush.msrb.mxu1 %v1396_v41  ;;  %v1449_v34 = vld [vmem:[#allocation9 + $0x868] sm:$0xff]  ;;  %v1499_v16 = vld [vmem:[#allocation9 + $0x9f8] sm:$0xff]  ;;  %v1482_v41 = vld [vmem:[#allocation9 + $0x970] sm:$0xff] }
  0xf5   : > { %1976 = vmatpush.msrb.mxu2 %v1415_v20  ;;  %1996 = vmatpush.msrb.mxu3 %v1431_v44  ;;  %v1465_v36 = vld [vmem:[#allocation9 + $0x8e8] sm:$0xff]  ;;  %v1447_v39 = vld [vmem:[#allocation9 + $0x858] sm:$0xff]  ;;  %v1498_v20 = vld [vmem:[#allocation9 + $0x9f0] sm:$0xff] }
  0xf6   : > { %1940 = vmatpush.msrb.mxu0 %v1379_v32  ;;  %1960 = vmatpush.msrb.mxu1 %v1395_v50  ;;  %v1463_v19 = vld [vmem:[#allocation9 + $0x8d8] sm:$0xff]  ;;  %v1446_v44 = vld [vmem:[#allocation9 + $0x850] sm:$0xff]  ;;  %v1481_v50 = vld [vmem:[#allocation9 + $0x968] sm:$0xff] }
  0xf7   : > { %1977 = vmatpush.msrb.mxu2 %v1414_v48  ;;  %1997 = vmatpush.msrb.mxu3 %v1430_v15  ;;  %v1462_v32 = vld [vmem:[#allocation9 + $0x8d0] sm:$0xff]  ;;  %v1497_v48 = vld [vmem:[#allocation9 + $0x9e8] sm:$0xff] }
  0xf8   : > { %1941 = vmatpush.msrb.mxu0 %v1378_v49  ;;  %1961 = vmatpush.msrb.mxu1 %v1394_v51  ;;  %v1445_v15 = vld [vmem:[#allocation9 + $0x848] sm:$0xff]  ;;  %v1496_v49 = vld [vmem:[#allocation9 + $0x9e0] sm:$0xff] }
  0xf9   : > { %1978 = vmatpush.msrb.mxu2 %v1413_v42  ;;  %1998 = vmatpush.msrb.mxu3 %v1429_v22  ;;  %v1444_v51 = vld [vmem:[#allocation9 + $0x840] sm:$0xff]  ;;  %v1479_v22 = vld [vmem:[#allocation9 + $0x958] sm:$0xff] }
  0xfa   : > { %1942 = vmatpush.msrb.mxu0 %v1377_v43  ;;  %1962 = vmatpush.msrb.mxu1 %v1393_v53  ;;  %v1460_v42 = vld [vmem:[#allocation9 + $0x8c0] sm:$0xff]  ;;  %v1495_v43 = vld [vmem:[#allocation9 + $0x9d8] sm:$0xff] }
  0xfb   : > { %1979 = vmatpush.msrb.mxu2 %v1412_v60  ;;  %1999 = vmatpush.msrb.mxu3 %v1428_v57  ;;  %v1443_v53 = vld [vmem:[#allocation9 + $0x838] sm:$0xff]  ;;  %v1478_v57 = vld [vmem:[#allocation9 + $0x950] sm:$0xff] }
  0xfc   : > { %1943 = vmatpush.msrb.mxu0 %v1376_v61  ;;  %1963 = vmatpush.msrb.mxu1 %v1392_v0  ;;  %v1459_v60 = vld [vmem:[#allocation9 + $0x8b8] sm:$0xff]  ;;  %v1494_v61 = vld [vmem:[#allocation9 + $0x9d0] sm:$0xff] }
  0xfd   : > { %1980 = vmatpush.msrb.mxu2 %v1411_v52  ;;  %2000 = vmatpush.msrb.mxu3 %v1427_v1  ;;  %v1442_v0 = vld [vmem:[#allocation9 + $0x830] sm:$0xff]  ;;  %v1477_v1 = vld [vmem:[#allocation9 + $0x948] sm:$0xff] }
  0xfe   : > { %1944 = vmatpush.msrb.mxu0 %v1375_v2  ;;  %1964 = vmatpush.msrb.mxu1 %v1391_v6  ;;  %v1458_v52 = vld [vmem:[#allocation9 + $0x8b0] sm:$0xff]  ;;  %v1493_v2 = vld [vmem:[#allocation9 + $0x9c8] sm:$0xff] }
  0xff   : > { %1981 = vmatpush.msrb.mxu2 %v1410_v59  ;;  %2001 = vmatpush.msrb.mxu3 %v1426_v10  ;;  %v1441_v6 = vld [vmem:[#allocation9 + $0x828] sm:$0xff]  ;;  %v1476_v10 = vld [vmem:[#allocation9 + $0x940] sm:$0xff] }
 0x100   : > { %1945 = vmatpush.msrb.mxu0 %v1374_v11  ;;  %1965 = vmatpush.msrb.mxu1 %v1390_v35  ;;  %v1457_v59 = vld [vmem:[#allocation9 + $0x8a8] sm:$0xff]  ;;  %v1492_v11 = vld [vmem:[#allocation9 + $0x9c0] sm:$0xff] }
 0x101   : > { %1982 = vmatpush.msrb.mxu2 %v1409_v12  ;;  %2002 = vmatpush.msrb.mxu3 %v1425_v40  ;;  %v1440_v35 = vld [vmem:[#allocation9 + $0x820] sm:$0xff]  ;;  %v1475_v40 = vld [vmem:[#allocation9 + $0x938] sm:$0xff] }
 0x102   : > { %1946 = vmatpush.msrb.mxu0 %v1373_v17  ;;  %1966 = vmatpush.msrb.mxu1 %v1389_v18  ;;  %v1456_v12 = vld [vmem:[#allocation9 + $0x8a0] sm:$0xff]  ;;  %v1491_v17 = vld [vmem:[#allocation9 + $0x9b8] sm:$0xff] }
 0x103   : > { %1983 = vmatpush.msrb.mxu2 %v1408_v21  ;;  %2003 = vmatpush.msrb.mxu3 %v1424_v46  ;;  %v1439_v18 = vld [vmem:[#allocation9 + $0x818] sm:$0xff]  ;;  %v1474_v46 = vld [vmem:[#allocation9 + $0x930] sm:$0xff] }
 0x104   : > { %1947 = vmatpush.msrb.mxu0 %v1372_v14  ;;  %1967 = vmatpush.msrb.mxu1 %v1388_v29  ;;  %v1455_v21 = vld [vmem:[#allocation9 + $0x898] sm:$0xff]  ;;  %v1490_v14 = vld [vmem:[#allocation9 + $0x9b0] sm:$0xff] }
 0x105   : > { %1984 = vmatpush.msrb.mxu2 %v1407_v54  ;;  %2004 = vmatpush.msrb.mxu3 %v1423_v63  ;;  %v1438_v29 = vld [vmem:[#allocation9 + $0x810] sm:$0xff]  ;;  %v1473_v63 = vld [vmem:[#allocation9 + $0x928] sm:$0xff] }
 0x106   : > { %1948 = vmatmul.f32.vlgmr.msrb.gmra.mxu0 %v3132_v45  ;;  %1968 = vmatmul.f32.vlgmr.msrb.gmra.mxu1 %v3135_v47  ;;  %v1448_v45 = vld [vmem:[#allocation9 + $0x860] sm:$0xff]  ;;  %v1454_v54 = vld [vmem:[#allocation9 + $0x890] sm:$0xff] }
 0x107   : > { %2012 = vmatpush.msra.mxu0 %v1451_v55  ;;  %2032 = vmatpush.msra.mxu1 %v1467_v56  ;;  %v1464_v47 = vld [vmem:[#allocation9 + $0x8e0] sm:$0xff]  ;;  %v1489_v55 = vld [vmem:[#allocation9 + $0x9a8] sm:$0xff] }
 0x108   : > { %1985 = vmatpush.msrb.mxu2 %v1406_v25  ;;  %2005 = vmatpush.msrb.mxu3 %v1422_v26  ;;  %v1437_v56 = vld [vmem:[#allocation9 + $0x808] sm:$0xff]  ;;  %v1472_v26 = vld [vmem:[#allocation9 + $0x920] sm:$0xff] }
 0x109   : > { %2013 = vmatpush.msra.mxu0 %v1450_v27  ;;  %2033 = vmatpush.msra.mxu1 %v1466_v58  ;;  %v1453_v25 = vld [vmem:[#allocation9 + $0x888] sm:$0xff]  ;;  %v1488_v27 = vld [vmem:[#allocation9 + $0x9a0] sm:$0xff] }
 0x10a   : > { %1986 = vmatpush.msrb.mxu2 %v1405_v31  ;;  %2006 = vmatpush.msrb.mxu3 %v1421_v7  ;;  %v1436_v58 = vld [vmem:[#allocation9 + $0x800] sm:$0xff]  ;;  %v1471_v7 = vld [vmem:[#allocation9 + $0x918] sm:$0xff] }
 0x10b   : > { %2014 = vmatpush.msra.mxu0 %v1449_v34  ;;  %2034 = vmatpush.msra.mxu1 %v1465_v36  ;;  %v1452_v31 = vld [vmem:[#allocation9 + $0x880] sm:$0xff]  ;;  %v1487_v34 = vld [vmem:[#allocation9 + $0x998] sm:$0xff] }
 0x10c   : > { %1987 = vmatpush.msrb.mxu2 %v1404_v13  ;;  %2007 = vmatpush.msrb.mxu3 %v1420_v37  ;;  %v1515_v36 = vld [vmem:[#allocation9 + $0xa78] sm:$0xff]  ;;  %v1470_v37 = vld [vmem:[#allocation9 + $0x910] sm:$0xff] }
 0x10d   : > { %1988 = vmatmul.f32.vlgmr.msrb.gmra.mxu2 %v3146_v23  ;;  %2008 = vmatmul.f32.vlgmr.msrb.gmra.mxu3 %v3149_v24  ;;  %v1461_v23 = vld [vmem:[#allocation9 + $0x8c8] sm:$0xff]  ;;  %v1480_v24 = vld [vmem:[#allocation9 + $0x960] sm:$0xff]  ;;  %v1531_v13 = vld [vmem:[#allocation9 + $0xaf8] sm:$0xff] }
 0x10e   : > { %2015 = vmatpush.msra.mxu0 %v1448_v45  ;;  %2035 = vmatpush.msra.mxu1 %v1464_v47  ;;  %v1486_v45 = vld [vmem:[#allocation9 + $0x990] sm:$0xff] }
 0x10f   : > { %2052 = vmatpush.msra.mxu2 %v1483_v38  ;;  %2072 = vmatpush.msra.mxu3 %v1499_v16  ;;  %v1514_v47 = vld [vmem:[#allocation9 + $0xa70] sm:$0xff]  ;;  %v1469_v16 = vld [vmem:[#allocation9 + $0x908] sm:$0xff] }
 0x110   : > { %2016 = vmatpush.msra.mxu0 %v1447_v39  ;;  %2036 = vmatpush.msra.mxu1 %v1463_v19  ;;  %v1530_v38 = vld [vmem:[#allocation9 + $0xaf0] sm:$0xff]  ;;  %v1485_v39 = vld [vmem:[#allocation9 + $0x988] sm:$0xff] }
 0x111   : > { %2053 = vmatpush.msra.mxu2 %v1482_v41  ;;  %2073 = vmatpush.msra.mxu3 %v1498_v20  ;;  %v1513_v19 = vld [vmem:[#allocation9 + $0xa68] sm:$0xff]  ;;  %v1468_v20 = vld [vmem:[#allocation9 + $0x900] sm:$0xff] }
 0x112   : > { %2017 = vmatpush.msra.mxu0 %v1446_v44  ;;  %2037 = vmatpush.msra.mxu1 %v1462_v32  ;;  %v1529_v41 = vld [vmem:[#allocation9 + $0xae8] sm:$0xff]  ;;  %v1484_v44 = vld [vmem:[#allocation9 + $0x980] sm:$0xff]  ;;  %v1547_v32 = vld [vmem:[#allocation9 + $0xb78] sm:$0xff] }
 0x113   : > { %2054 = vmatpush.msra.mxu2 %v1481_v50  ;;  %2074 = vmatpush.msra.mxu3 %v1497_v48  ;;  %v1563_v50 = vld [vmem:[#allocation9 + $0xbf8] sm:$0xff] }
 0x114   : > { %2018 = vmatpush.msra.mxu0 %v1445_v15  ;;  %2038 = vmatpush.msra.mxu1 %v1461_v23  ;;  %v1511_v48 = vld [vmem:[#allocation9 + $0xa58] sm:$0xff]  ;;  %v1546_v23 = vld [vmem:[#allocation9 + $0xb70] sm:$0xff] }
 0x115   : > { %2055 = vmatpush.msra.mxu2 %v1480_v24  ;;  %2075 = vmatpush.msra.mxu3 %v1496_v49  ;;  %v1527_v15 = vld [vmem:[#allocation9 + $0xad8] sm:$0xff]  ;;  %v1562_v24 = vld [vmem:[#allocation9 + $0xbf0] sm:$0xff] }
 0x116   : > { %2019 = vmatpush.msra.mxu0 %v1444_v51  ;;  %2039 = vmatpush.msra.mxu1 %v1460_v42  ;;  %v1510_v49 = vld [vmem:[#allocation9 + $0xa50] sm:$0xff]  ;;  %v1545_v42 = vld [vmem:[#allocation9 + $0xb68] sm:$0xff] }
 0x117   : > { %2056 = vmatpush.msra.mxu2 %v1479_v22  ;;  %2076 = vmatpush.msra.mxu3 %v1495_v43  ;;  %v1526_v51 = vld [vmem:[#allocation9 + $0xad0] sm:$0xff]  ;;  %v1561_v22 = vld [vmem:[#allocation9 + $0xbe8] sm:$0xff] }
 0x118   : > { %2020 = vmatpush.msra.mxu0 %v1443_v53  ;;  %2040 = vmatpush.msra.mxu1 %v1459_v60  ;;  %v1509_v43 = vld [vmem:[#allocation9 + $0xa48] sm:$0xff]  ;;  %v1560_v53 = vld [vmem:[#allocation9 + $0xbe0] sm:$0xff] }
 0x119   : > { %2057 = vmatpush.msra.mxu2 %v1478_v57  ;;  %2077 = vmatpush.msra.mxu3 %v1494_v61  ;;  %v1508_v60 = vld [vmem:[#allocation9 + $0xa40] sm:$0xff]  ;;  %v1543_v61 = vld [vmem:[#allocation9 + $0xb58] sm:$0xff] }
 0x11a   : > { %2021 = vmatpush.msra.mxu0 %v1442_v0  ;;  %2041 = vmatpush.msra.mxu1 %v1458_v52  ;;  %v1524_v57 = vld [vmem:[#allocation9 + $0xac0] sm:$0xff]  ;;  %v1559_v0 = vld [vmem:[#allocation9 + $0xbd8] sm:$0xff] }
 0x11b   : > { %2058 = vmatpush.msra.mxu2 %v1477_v1  ;;  %2078 = vmatpush.msra.mxu3 %v1493_v2  ;;  %v1507_v52 = vld [vmem:[#allocation9 + $0xa38] sm:$0xff]  ;;  %v1542_v2 = vld [vmem:[#allocation9 + $0xb50] sm:$0xff] }
 0x11c   : > { %2022 = vmatpush.msra.mxu0 %v1441_v6  ;;  %2042 = vmatpush.msra.mxu1 %v1457_v59  ;;  %v1523_v1 = vld [vmem:[#allocation9 + $0xab8] sm:$0xff]  ;;  %v1558_v6 = vld [vmem:[#allocation9 + $0xbd0] sm:$0xff] }
 0x11d   : > { %2059 = vmatpush.msra.mxu2 %v1476_v10  ;;  %2079 = vmatpush.msra.mxu3 %v1492_v11  ;;  %v1506_v59 = vld [vmem:[#allocation9 + $0xa30] sm:$0xff]  ;;  %v1541_v11 = vld [vmem:[#allocation9 + $0xb48] sm:$0xff] }
 0x11e   : > { %2023 = vmatpush.msra.mxu0 %v1440_v35  ;;  %2043 = vmatpush.msra.mxu1 %v1456_v12  ;;  %v1522_v10 = vld [vmem:[#allocation9 + $0xab0] sm:$0xff]  ;;  %v1557_v35 = vld [vmem:[#allocation9 + $0xbc8] sm:$0xff] }
 0x11f   : > { %2060 = vmatpush.msra.mxu2 %v1475_v40  ;;  %2080 = vmatpush.msra.mxu3 %v1491_v17  ;;  %v1505_v12 = vld [vmem:[#allocation9 + $0xa28] sm:$0xff]  ;;  %v1540_v17 = vld [vmem:[#allocation9 + $0xb40] sm:$0xff] }
 0x120   : > { %2024 = vmatpush.msra.mxu0 %v1439_v18  ;;  %2044 = vmatpush.msra.mxu1 %v1455_v21  ;;  %v1521_v40 = vld [vmem:[#allocation9 + $0xaa8] sm:$0xff]  ;;  %v1556_v18 = vld [vmem:[#allocation9 + $0xbc0] sm:$0xff] }
 0x121   : > { %2061 = vmatpush.msra.mxu2 %v1474_v46  ;;  %2081 = vmatpush.msra.mxu3 %v1490_v14  ;;  %v1504_v21 = vld [vmem:[#allocation9 + $0xa20] sm:$0xff]  ;;  %v1539_v14 = vld [vmem:[#allocation9 + $0xb38] sm:$0xff] }
 0x122   : > { %2025 = vmatpush.msra.mxu0 %v1438_v29  ;;  %2045 = vmatpush.msra.mxu1 %v1454_v54  ;;  %v1520_v46 = vld [vmem:[#allocation9 + $0xaa0] sm:$0xff]  ;;  %v1555_v29 = vld [vmem:[#allocation9 + $0xbb8] sm:$0xff] }
 0x123   : > { %2062 = vmatpush.msra.mxu2 %v1473_v63  ;;  %2082 = vmatpush.msra.mxu3 %v1489_v55  ;;  %v1503_v54 = vld [vmem:[#allocation9 + $0xa18] sm:$0xff]  ;;  %v1538_v55 = vld [vmem:[#allocation9 + $0xb30] sm:$0xff] }
 0x124   : > { %2026 = vmatpush.msra.mxu0 %v1437_v56  ;;  %2046 = vmatpush.msra.mxu1 %v1453_v25  ;;  %v1519_v63 = vld [vmem:[#allocation9 + $0xa98] sm:$0xff]  ;;  %v1554_v56 = vld [vmem:[#allocation9 + $0xbb0] sm:$0xff] }
 0x125   : > { %2063 = vmatpush.msra.mxu2 %v1472_v26  ;;  %2083 = vmatpush.msra.mxu3 %v1488_v27  ;;  %v1502_v25 = vld [vmem:[#allocation9 + $0xa10] sm:$0xff]  ;;  %v1537_v27 = vld [vmem:[#allocation9 + $0xb28] sm:$0xff] }
 0x126   : > { %2027 = vmatpush.msra.mxu0 %v1436_v58  ;;  %2047 = vmatpush.msra.mxu1 %v1452_v31  ;;  %v1518_v26 = vld [vmem:[#allocation9 + $0xa90] sm:$0xff]  ;;  %v1553_v58 = vld [vmem:[#allocation9 + $0xba8] sm:$0xff] }
 0x127   : > { %2064 = vmatpush.msra.mxu2 %v1471_v7  ;;  %2084 = vmatpush.msra.mxu3 %v1487_v34  ;;  %v1501_v31 = vld [vmem:[#allocation9 + $0xa08] sm:$0xff]  ;;  %v1536_v34 = vld [vmem:[#allocation9 + $0xb20] sm:$0xff] }
 0x128   : > { %2028 = vmatmul.f32.vlgmr.msra.gmra.mxu0 %v3152_v28  ;;  %2048 = vmatmul.f32.vlgmr.msra.gmra.mxu1 %v3155_v30  ;;  %v1512_v28 = vld [vmem:[#allocation9 + $0xa60] sm:$0xff]  ;;  %v1517_v7 = vld [vmem:[#allocation9 + $0xa88] sm:$0xff] }
 0x129   : > { %2092 = vmatpush.msrb.mxu0 %v1515_v36  ;;  %2112 = vmatpush.msrb.mxu1 %v1531_v13  ;;  %v1528_v30 = vld [vmem:[#allocation9 + $0xae0] sm:$0xff] }
 0x12a   : > { %2065 = vmatpush.msra.mxu2 %v1470_v37  ;;  %2085 = vmatpush.msra.mxu3 %v1486_v45  ;;  %v1552_v36 = vld [vmem:[#allocation9 + $0xba0] sm:$0xff]  ;;  %v1535_v45 = vld [vmem:[#allocation9 + $0xb18] sm:$0xff] }
 0x12b   : > { %2093 = vmatpush.msrb.mxu0 %v1514_v47  ;;  %2113 = vmatpush.msrb.mxu1 %v1530_v38  ;;  %v1500_v13 = vld [vmem:[#allocation9 + $0xa00] sm:$0xff]  ;;  %v1551_v47 = vld [vmem:[#allocation9 + $0xb98] sm:$0xff] }
 0x12c   : > { %2066 = vmatpush.msra.mxu2 %v1469_v16  ;;  %2086 = vmatpush.msra.mxu3 %v1485_v39  ;;  %v1516_v37 = vld [vmem:[#allocation9 + $0xa80] sm:$0xff]  ;;  %v1579_v38 = vld [vmem:[#allocation9 + $0xc78] sm:$0xff]  ;;  %v1534_v39 = vld [vmem:[#allocation9 + $0xb10] sm:$0xff] }
 0x12d   : > { %2094 = vmatpush.msrb.mxu0 %v1513_v19  ;;  %2114 = vmatpush.msrb.mxu1 %v1529_v41  ;;  %v1595_v16 = vld [vmem:[#allocation9 + $0xcf8] sm:$0xff]  ;;  %v1550_v19 = vld [vmem:[#allocation9 + $0xb90] sm:$0xff] }
 0x12e   : > { %2067 = vmatpush.msra.mxu2 %v1468_v20  ;;  %2087 = vmatpush.msra.mxu3 %v1484_v44  ;;  %v1578_v41 = vld [vmem:[#allocation9 + $0xc70] sm:$0xff]  ;;  %v1533_v44 = vld [vmem:[#allocation9 + $0xb08] sm:$0xff] }
 0x12f   : > { %2068 = vmatmul.f32.vlgmr.msra.gmra.mxu2 %v3168_v3  ;;  %2088 = vmatmul.f32.vlgmr.msra.gmra.mxu3 %v3171_v4  ;;  %v1525_v3 = vld [vmem:[#allocation9 + $0xac8] sm:$0xff]  ;;  %v1544_v4 = vld [vmem:[#allocation9 + $0xb60] sm:$0xff]  ;;  %v1594_v20 = vld [vmem:[#allocation9 + $0xcf0] sm:$0xff] }
 0x130   : > { %2095 = vmatpush.msrb.mxu0 %v1512_v28  ;;  %2115 = vmatpush.msrb.mxu1 %v1528_v30  ;;  %v1549_v28 = vld [vmem:[#allocation9 + $0xb88] sm:$0xff] }
 0x131   : > { %2132 = vmatpush.msrb.mxu2 %v1547_v32  ;;  %2152 = vmatpush.msrb.mxu3 %v1563_v50  ;;  %v1577_v30 = vld [vmem:[#allocation9 + $0xc68] sm:$0xff]  ;;  %v1532_v50 = vld [vmem:[#allocation9 + $0xb00] sm:$0xff] }
 0x132   : > { %2096 = vmatpush.msrb.mxu0 %v1511_v48  ;;  %2116 = vmatpush.msrb.mxu1 %v1527_v15  ;;  %v1593_v32 = vld [vmem:[#allocation9 + $0xce8] sm:$0xff]  ;;  %v1548_v48 = vld [vmem:[#allocation9 + $0xb80] sm:$0xff]  ;;  %v1611_v15 = vld [vmem:[#allocation9 + $0xd78] sm:$0xff] }
 0x133   : > { %2133 = vmatpush.msrb.mxu2 %v1546_v23  ;;  %2153 = vmatpush.msrb.mxu3 %v1562_v24  ;;  %v1627_v23 = vld [vmem:[#allocation9 + $0xdf8] sm:$0xff] }
 0x134   : > { %2097 = vmatpush.msrb.mxu0 %v1510_v49  ;;  %2117 = vmatpush.msrb.mxu1 %v1526_v51  ;;  %v1575_v24 = vld [vmem:[#allocation9 + $0xc58] sm:$0xff]  ;;  %v1610_v51 = vld [vmem:[#allocation9 + $0xd70] sm:$0xff] }
 0x135   : > { %2134 = vmatpush.msrb.mxu2 %v1545_v42  ;;  %2154 = vmatpush.msrb.mxu3 %v1561_v22  ;;  %v1591_v49 = vld [vmem:[#allocation9 + $0xcd8] sm:$0xff]  ;;  %v1626_v42 = vld [vmem:[#allocation9 + $0xdf0] sm:$0xff] }
 0x136   : > { %2098 = vmatpush.msrb.mxu0 %v1509_v43  ;;  %2118 = vmatpush.msrb.mxu1 %v1525_v3  ;;  %v1574_v22 = vld [vmem:[#allocation9 + $0xc50] sm:$0xff]  ;;  %v1609_v3 = vld [vmem:[#allocation9 + $0xd68] sm:$0xff] }
 0x137   : > { %2135 = vmatpush.msrb.mxu2 %v1544_v4  ;;  %2155 = vmatpush.msrb.mxu3 %v1560_v53  ;;  %v1590_v43 = vld [vmem:[#allocation9 + $0xcd0] sm:$0xff]  ;;  %v1625_v4 = vld [vmem:[#allocation9 + $0xde8] sm:$0xff] }
 0x138   : > { %2099 = vmatpush.msrb.mxu0 %v1508_v60  ;;  %2119 = vmatpush.msrb.mxu1 %v1524_v57  ;;  %v1573_v53 = vld [vmem:[#allocation9 + $0xc48] sm:$0xff]  ;;  %v1624_v60 = vld [vmem:[#allocation9 + $0xde0] sm:$0xff] }
 0x139   : > { %2136 = vmatpush.msrb.mxu2 %v1543_v61  ;;  %2156 = vmatpush.msrb.mxu3 %v1559_v0  ;;  %v1572_v57 = vld [vmem:[#allocation9 + $0xc40] sm:$0xff]  ;;  %v1607_v0 = vld [vmem:[#allocation9 + $0xd58] sm:$0xff] }
 0x13a   : > { %2100 = vmatpush.msrb.mxu0 %v1507_v52  ;;  %2120 = vmatpush.msrb.mxu1 %v1523_v1  ;;  %v1588_v61 = vld [vmem:[#allocation9 + $0xcc0] sm:$0xff]  ;;  %v1623_v52 = vld [vmem:[#allocation9 + $0xdd8] sm:$0xff] }
 0x13b   : > { %2137 = vmatpush.msrb.mxu2 %v1542_v2  ;;  %2157 = vmatpush.msrb.mxu3 %v1558_v6  ;;  %v1571_v1 = vld [vmem:[#allocation9 + $0xc38] sm:$0xff]  ;;  %v1606_v6 = vld [vmem:[#allocation9 + $0xd50] sm:$0xff] }
 0x13c   : > { %2101 = vmatpush.msrb.mxu0 %v1506_v59  ;;  %2121 = vmatpush.msrb.mxu1 %v1522_v10  ;;  %v1587_v2 = vld [vmem:[#allocation9 + $0xcb8] sm:$0xff]  ;;  %v1622_v59 = vld [vmem:[#allocation9 + $0xdd0] sm:$0xff] }
 0x13d   : > { %2138 = vmatpush.msrb.mxu2 %v1541_v11  ;;  %2158 = vmatpush.msrb.mxu3 %v1557_v35  ;;  %v1570_v10 = vld [vmem:[#allocation9 + $0xc30] sm:$0xff]  ;;  %v1605_v35 = vld [vmem:[#allocation9 + $0xd48] sm:$0xff] }
 0x13e   : > { %2102 = vmatpush.msrb.mxu0 %v1505_v12  ;;  %2122 = vmatpush.msrb.mxu1 %v1521_v40  ;;  %v1586_v11 = vld [vmem:[#allocation9 + $0xcb0] sm:$0xff]  ;;  %v1621_v12 = vld [vmem:[#allocation9 + $0xdc8] sm:$0xff] }
 0x13f   : > { %2139 = vmatpush.msrb.mxu2 %v1540_v17  ;;  %2159 = vmatpush.msrb.mxu3 %v1556_v18  ;;  %v1569_v40 = vld [vmem:[#allocation9 + $0xc28] sm:$0xff]  ;;  %v1604_v18 = vld [vmem:[#allocation9 + $0xd40] sm:$0xff] }
 0x140   : > { %2103 = vmatpush.msrb.mxu0 %v1504_v21  ;;  %2123 = vmatpush.msrb.mxu1 %v1520_v46  ;;  %v1585_v17 = vld [vmem:[#allocation9 + $0xca8] sm:$0xff]  ;;  %v1620_v21 = vld [vmem:[#allocation9 + $0xdc0] sm:$0xff]  ;;  %v858_v46 = vpop.f32.mrf.mxu0 }
 0x141   : > { %2140 = vmatpush.msrb.mxu2 %v1539_v14  ;;  %2160 = vmatpush.msrb.mxu3 %v1555_v29  ;;  %v878_v14 = vpop.f32.mrf.mxu1  ;;  %v1568_v29 = vld [vmem:[#allocation9 + $0xc20] sm:$0xff] }
 0x142   : > { %2104 = vmatpush.msrb.mxu0 %v1503_v54  ;;  %2124 = vmatpush.msrb.mxu1 %v1519_v63  ;;  %v1584_v54 = vld [vmem:[#allocation9 + $0xca0] sm:$0xff]  ;;  %v1603_v63 = vld [vmem:[#allocation9 + $0xd38] sm:$0xff] }
 0x143   : > { %2141 = vmatpush.msrb.mxu2 %v1538_v55  ;;  %2161 = vmatpush.msrb.mxu3 %v1554_v56  ;;  %v1619_v55 = vld [vmem:[#allocation9 + $0xdb8] sm:$0xff] }
 0x144   : > { %2105 = vmatpush.msrb.mxu0 %v1502_v25  ;;  %2125 = vmatpush.msrb.mxu1 %v1518_v26  ;;  %v1567_v56 = vld [vmem:[#allocation9 + $0xc18] sm:$0xff]  ;;  %v859_v26 = vadd.f32 %v858_v46, %v3083_v62  ;;  %v1689_v46 = vld [vmem:[#allocation9 + $0xfe8] sm:$0xff] }
 0x145   : > { %2142 = vmatpush.msrb.mxu2 %v1537_v27  ;;  %2162 = vmatpush.msrb.mxu3 %v1553_v58  ;;  %v1583_v25 = vld [vmem:[#allocation9 + $0xc98] sm:$0xff]  ;;  %v879_v27 = vadd.f32 %v878_v14, %v3083_v62  ;;  %v1602_v58 = vld [vmem:[#allocation9 + $0xd30] sm:$0xff]  ;;  %v1637_v14 = vld [vmem:[#allocation9 + $0xe48] sm:$0xff] }
 0x146   : > { %2106 = vmatpush.msrb.mxu0 %v1501_v31  ;;  %2126 = vmatpush.msrb.mxu1 %v1517_v7  ;;  %v1618_v31 = vld [vmem:[#allocation9 + $0xdb0] sm:$0xff] }
 0x147   : > { %2143 = vmatpush.msrb.mxu2 %v1536_v34  ;;  %2163 = vmatpush.msrb.mxu3 %v1552_v36  ;;  %v1566_v7 = vld [vmem:[#allocation9 + $0xc10] sm:$0xff]  ;;  %v1601_v36 = vld [vmem:[#allocation9 + $0xd28] sm:$0xff] }
 0x148   : > { %2107 = vmatpush.msrb.mxu0 %v1500_v13  ;;  %2127 = vmatpush.msrb.mxu1 %v1516_v37  ;;  %v1582_v34 = vld [vmem:[#allocation9 + $0xc90] sm:$0xff]  ;;  %v1617_v13 = vld [vmem:[#allocation9 + $0xda8] sm:$0xff] }
 0x149   : > { %2144 = vmatpush.msrb.mxu2 %v1535_v45  ;;  %2164 = vmatpush.msrb.mxu3 %v1551_v47  ;;  %v1108_v37 = vld.sshfl [vmem:[#allocation1] sm:$0xff pattern:$0x75316420]  ;;  %v1565_v45 = vld [vmem:[#allocation9 + $0xc08] sm:$0xff] }
 0x14a   : > { %2108 = vmatmul.f32.vlgmr.msrb.gmra.mxu0 %v3174_v8  ;;  %2128 = vmatmul.f32.vlgmr.msrb.gmra.mxu1 %v3177_v9  ;;  %v1576_v8 = vld [vmem:[#allocation9 + $0xc60] sm:$0xff]  ;;  %v1581_v47 = vld [vmem:[#allocation9 + $0xc88] sm:$0xff] }
 0x14b   : > { %2172 = vmatpush.msra.mxu0 %v1579_v38  ;;  %2192 = vmatpush.msra.mxu1 %v1595_v16  ;;  %v1592_v9 = vld [vmem:[#allocation9 + $0xce0] sm:$0xff]  ;;  %v1025_v38 = vmax.f32 %v859_v26, 0.0  ;;  %v1026_v16 = vmax.f32 %v879_v27, 0.0  ;;  %v1687_v26 = vld [vmem:[#allocation9 + $0xfd8] sm:$0xff] }
 0x14c   : > { %2145 = vmatpush.msrb.mxu2 %v1534_v39  ;;  %2165 = vmatpush.msrb.mxu3 %v1550_v19  ;;  %v898_v39 = vpop.f32.mrf.mxu2  ;;  %v918_v19 = vpop.f32.mrf.mxu3  ;;  %v1635_v27 = vld [vmem:[#allocation9 + $0xe38] sm:$0xff] }
 0x14d   : > { %2173 = vmatpush.msra.mxu0 %v1578_v41  ;;  %2193 = vmatpush.msra.mxu1 %v1594_v20  ;;  %v1600_v41 = vld [vmem:[#allocation9 + $0xd20] sm:$0xff] }
 0x14e   : > { %2146 = vmatpush.msrb.mxu2 %v1533_v44  ;;  %2166 = vmatpush.msrb.mxu3 %v1549_v28  ;;  %v1616_v20 = vld [vmem:[#allocation9 + $0xda0] sm:$0xff] }
 0x14f   : > { %2174 = vmatpush.msra.mxu0 %v1577_v30  ;;  %2194 = vmatpush.msra.mxu1 %v1593_v32  ;;  %v1109_v44 = vld.sshfl [vmem:[#allocation1 + $0x8] sm:$0xff pattern:$0x75316420] }
 0x150   : > { %2147 = vmatpush.msrb.mxu2 %v1532_v50  ;;  %2167 = vmatpush.msrb.mxu3 %v1548_v48  ;;  %v1564_v28 = vld [vmem:[#allocation9 + $0xc00] sm:$0xff]  ;;  %v1599_v32 = vld [vmem:[#allocation9 + $0xd18] sm:$0xff]  ;;  %v899_v48 = vadd.f32 %v898_v39, %v3083_v62  ;;  %v938_v39 = vpop.f32.mrf.mxu0 }
 0x151   : > { %2148 = vmatmul.f32.vlgmr.msrb.gmra.mxu2 %v3184_v33  ;;  %2168 = vmatmul.f32.vlgmr.msrb.gmra.mxu3 %v3187_v5  ;;  %v1589_v33 = vld [vmem:[#allocation9 + $0xcc8] sm:$0xff]  ;;  %v1608_v5 = vld [vmem:[#allocation9 + $0xd60] sm:$0xff]  ;;  %v1615_v50 = vld [vmem:[#allocation9 + $0xd98] sm:$0xff] }
 0x152   : > { %2175 = vmatpush.msra.mxu0 %v1576_v8  ;;  %2195 = vmatpush.msra.mxu1 %v1592_v9  ;;  %v1580_v30 = vld [vmem:[#allocation9 + $0xc80] sm:$0xff]  ;;  %v919_v8 = vadd.f32 %v918_v19, %v3083_v62  ;;  %v1172_v9 = vmul.f32 %v1108_v37, %v1025_v38  ;;  %v1685_v37 = vld [vmem:[#allocation9 + $0xfc8] sm:$0xff]  ;;  %v958_v19 = vpop.f32.mrf.mxu1 }
 0x153   : > { %2212 = vmatpush.msra.mxu2 %v1611_v15  ;;  %2232 = vmatpush.msra.mxu3 %v1627_v23  ;;  %v1173_v15 = vmul.f32 %v1109_v44, %v1026_v16  ;;  %v1643_v23 = vld [vmem:[#allocation9 + $0xe78] sm:$0xff]  ;;  %v1668_v38 = vld [vmem:[#allocation9 + $0xf40] sm:$0xff] }
 0x154   : > { %2176 = vmatpush.msra.mxu0 %v1575_v24  ;;  %2196 = vmatpush.msra.mxu1 %v1591_v49  ;;  %v1659_v24 = vld [vmem:[#allocation9 + $0xef8] sm:$0xff]  ;;  %v1598_v49 = vld [vmem:[#allocation9 + $0xd10] sm:$0xff]  ;;  %v1684_v16 = vld [vmem:[#allocation9 + $0xfc0] sm:$0xff] }
 0x155   : > { %2213 = vmatpush.msra.mxu2 %v1610_v51  ;;  %2233 = vmatpush.msra.mxu3 %v1626_v42  ;;  %v1614_v51 = vld [vmem:[#allocation9 + $0xd90] sm:$0xff]  ;;  %v1110_v42 = vld.sshfl [vmem:[#allocation1 + $0x10] sm:$0xff pattern:$0x75316420]  ;;  %v1667_v44 = vld [vmem:[#allocation9 + $0xf38] sm:$0xff] }
 0x156   : > { %2177 = vmatpush.msra.mxu0 %v1574_v22  ;;  %2197 = vmatpush.msra.mxu1 %v1590_v43  ;;  %v1642_v22 = vld [vmem:[#allocation9 + $0xe70] sm:$0xff] }
 0x157   : > { %2214 = vmatpush.msra.mxu2 %v1609_v3  ;;  %2234 = vmatpush.msra.mxu3 %v1625_v4  ;;  %v1658_v43 = vld [vmem:[#allocation9 + $0xef0] sm:$0xff]  ;;  %v1027_v3 = vmax.f32 %v899_v48, 0.0  ;;  %v1028_v4 = vmax.f32 %v919_v8, 0.0  ;;  %v959_v48 = vadd.f32 %v958_v19, %v3083_v62 }
 0x158   : > { %2178 = vmatpush.msra.mxu0 %v1573_v53  ;;  %2198 = vmatpush.msra.mxu1 %v1589_v33  ;;  %v1597_v53 = vld [vmem:[#allocation9 + $0xd08] sm:$0xff]  ;;  %v1666_v8 = vld [vmem:[#allocation9 + $0xf30] sm:$0xff] }
 0x159   : > { %2215 = vmatpush.msra.mxu2 %v1608_v5  ;;  %2235 = vmatpush.msra.mxu3 %v1624_v60  ;;  %v1613_v33 = vld [vmem:[#allocation9 + $0xd88] sm:$0xff] }
 0x15a   : > { %2179 = vmatpush.msra.mxu0 %v1572_v57  ;;  %2199 = vmatpush.msra.mxu1 %v1588_v61  ;;  %v1111_v5 = vld.sshfl [vmem:[#allocation1 + $0x18] sm:$0xff pattern:$0x75316420]  ;;  %v1596_v61 = vld [vmem:[#allocation9 + $0xd00] sm:$0xff] }
 0x15b   : > { %2216 = vmatpush.msra.mxu2 %v1607_v0  ;;  %2236 = vmatpush.msra.mxu3 %v1623_v52  ;;  %v1641_v60 = vld [vmem:[#allocation9 + $0xe68] sm:$0xff]  ;;  %v1612_v0 = vld [vmem:[#allocation9 + $0xd80] sm:$0xff]  ;;  %v1174_v52 = vmul.f32 %v1110_v42, %v1027_v3  ;;  %v978_v42 = vpop.f32.mrf.mxu2 }
 0x15c   : > { %2180 = vmatpush.msra.mxu0 %v1571_v1  ;;  %2200 = vmatpush.msra.mxu1 %v1587_v2  ;;  %v1657_v57 = vld [vmem:[#allocation9 + $0xee8] sm:$0xff]  ;;  %v1175_v1 = vmul.f32 %v1111_v5, %v1028_v4  ;;  %v1640_v2 = vld [vmem:[#allocation9 + $0xe60] sm:$0xff] }
 0x15d   : > { %2217 = vmatpush.msra.mxu2 %v1606_v6  ;;  %2237 = vmatpush.msra.mxu3 %v1622_v59  ;;  %v1656_v6 = vld [vmem:[#allocation9 + $0xee0] sm:$0xff]  ;;  %v1675_v59 = vld [vmem:[#allocation9 + $0xf78] sm:$0xff]  ;;  %v1645_v3 = vld [vmem:[#allocation9 + $0xe88] sm:$0xff] }
 0x15e   : > { %2181 = vmatpush.msra.mxu0 %v1570_v10  ;;  %2201 = vmatpush.msra.mxu1 %v1586_v11  ;;  %v1691_v10 = vld [vmem:[#allocation9 + $0xff8] sm:$0xff]  ;;  %v1680_v5 = vld [vmem:[#allocation9 + $0xfa0] sm:$0xff] }
 0x15f   : > { %2218 = vmatpush.msra.mxu2 %v1605_v35  ;;  %2238 = vmatpush.msra.mxu3 %v1621_v12  ;;  %v1639_v11 = vld [vmem:[#allocation9 + $0xe58] sm:$0xff]  ;;  %v1674_v12 = vld [vmem:[#allocation9 + $0xf70] sm:$0xff] }
 0x160   : > { %2182 = vmatpush.msra.mxu0 %v1569_v40  ;;  %2202 = vmatpush.msra.mxu1 %v1585_v17  ;;  %v1655_v35 = vld [vmem:[#allocation9 + $0xed8] sm:$0xff]  ;;  %v1690_v40 = vld [vmem:[#allocation9 + $0xff0] sm:$0xff] }
 0x161   : > { %2219 = vmatpush.msra.mxu2 %v1604_v18  ;;  %2239 = vmatpush.msra.mxu3 %v1620_v21  ;;  %v1638_v17 = vld [vmem:[#allocation9 + $0xe50] sm:$0xff]  ;;  %v1673_v21 = vld [vmem:[#allocation9 + $0xf68] sm:$0xff] }
 0x162   : > { %2183 = vmatpush.msra.mxu0 %v1568_v29  ;;  %2203 = vmatpush.msra.mxu1 %v1584_v54  ;;  %v1654_v18 = vld [vmem:[#allocation9 + $0xed0] sm:$0xff]  ;;  %v1653_v29 = vld [vmem:[#allocation9 + $0xec8] sm:$0xff]  ;;  %v1672_v54 = vld [vmem:[#allocation9 + $0xf60] sm:$0xff] }
 0x163   : > { %2220 = vmatpush.msra.mxu2 %v1603_v63  ;;  %2240 = vmatpush.msra.mxu3 %v1619_v55  ;;  %v1688_v63 = vld [vmem:[#allocation9 + $0xfe0] sm:$0xff] }
 0x164   : > { %2184 = vmatpush.msra.mxu0 %v1567_v56  ;;  %2204 = vmatpush.msra.mxu1 %v1583_v25  ;;  %v1636_v55 = vld [vmem:[#allocation9 + $0xe40] sm:$0xff]  ;;  %v1671_v25 = vld [vmem:[#allocation9 + $0xf58] sm:$0xff] }
 0x165   : > { %2221 = vmatpush.msra.mxu2 %v1602_v58  ;;  %2241 = vmatpush.msra.mxu3 %v1618_v31  ;;  %v1652_v56 = vld [vmem:[#allocation9 + $0xec0] sm:$0xff]  ;;  %v1651_v58 = vld [vmem:[#allocation9 + $0xeb8] sm:$0xff]  ;;  %v1670_v31 = vld [vmem:[#allocation9 + $0xf50] sm:$0xff] }
 0x166   : > { %2185 = vmatpush.msra.mxu0 %v1566_v7  ;;  %2205 = vmatpush.msra.mxu1 %v1582_v34  ;;  %v1686_v7 = vld [vmem:[#allocation9 + $0xfd0] sm:$0xff] }
 0x167   : > { %2222 = vmatpush.msra.mxu2 %v1601_v36  ;;  %2242 = vmatpush.msra.mxu3 %v1617_v13  ;;  %v1634_v34 = vld [vmem:[#allocation9 + $0xe30] sm:$0xff]  ;;  %v1669_v13 = vld [vmem:[#allocation9 + $0xf48] sm:$0xff] }
 0x168   : > { %2186 = vmatpush.msra.mxu0 %v1565_v45  ;;  %2206 = vmatpush.msra.mxu1 %v1581_v47  ;;  %v1650_v36 = vld [vmem:[#allocation9 + $0xeb0] sm:$0xff]  ;;  %v1633_v45 = vld [vmem:[#allocation9 + $0xe28] sm:$0xff] }
 0x169   : > { %2223 = vmatpush.msra.mxu2 %v1600_v41  ;;  %2243 = vmatpush.msra.mxu3 %v1616_v20  ;;  %v1649_v47 = vld [vmem:[#allocation9 + $0xea8] sm:$0xff]  ;;  %v1632_v41 = vld [vmem:[#allocation9 + $0xe20] sm:$0xff] }
 0x16a   : > { %2187 = vmatpush.msra.mxu0 %v1564_v28  ;;  %2207 = vmatpush.msra.mxu1 %v1580_v30  ;;  %v1648_v20 = vld [vmem:[#allocation9 + $0xea0] sm:$0xff]  ;;  %v1683_v28 = vld [vmem:[#allocation9 + $0xfb8] sm:$0xff] }
 0x16b   : > { %2224 = vmatpush.msra.mxu2 %v1599_v32  ;;  %2244 = vmatpush.msra.mxu3 %v1615_v50  ;;  %v1631_v30 = vld [vmem:[#allocation9 + $0xe18] sm:$0xff]  ;;  %v939_v50 = vadd.f32 %v938_v39, %v3083_v62 }
 0x16c   : > { %2188 = vmatmul.f32.vlgmr.msra.gmra.mxu0 %v1172_v9  ;;  %2208 = vmatmul.f32.vlgmr.msra.gmra.mxu1 %v1173_v15  ;;  %v1647_v32 = vld [vmem:[#allocation9 + $0xe98] sm:$0xff]  ;;  %v1682_v9 = vld [vmem:[#allocation9 + $0xfb0] sm:$0xff] }
 0x16d   : > { %2252 = vmatpush.msrb.mxu0 %v1643_v23  ;;  %2272 = vmatpush.msrb.mxu1 %v1659_v24  ;;  %v1630_v15 = vld [vmem:[#allocation9 + $0xe10] sm:$0xff]  ;;  %v1665_v24 = vld [vmem:[#allocation9 + $0xf28] sm:$0xff]  ;;  %v1029_v4 = vmax.f32 %v939_v50, 0.0 }
 0x16e   : > { %2225 = vmatpush.msra.mxu2 %v1598_v49  ;;  %2245 = vmatpush.msra.mxu3 %v1614_v51  ;;  %v1646_v23 = vld [vmem:[#allocation9 + $0xe90] sm:$0xff]  ;;  %v1681_v49 = vld [vmem:[#allocation9 + $0xfa8] sm:$0xff] }
 0x16f   : > { %2253 = vmatpush.msrb.mxu0 %v1642_v22  ;;  %2273 = vmatpush.msrb.mxu1 %v1658_v43  ;;  %v1112_v51 = vld.sshfl [vmem:[#allocation1 + $0x20] sm:$0xff pattern:$0x75316420]  ;;  %v998_v22 = vpop.f32.mrf.mxu3  ;;  %v1629_v43 = vld [vmem:[#allocation9 + $0xe08] sm:$0xff] }
 0x170   : > { %2226 = vmatpush.msra.mxu2 %v1597_v53  ;;  %2246 = vmatpush.msra.mxu3 %v1613_v33  ;;  %v1030_v53 = vmax.f32 %v959_v48, 0.0  ;;  %v1664_v33 = vld [vmem:[#allocation9 + $0xf20] sm:$0xff] }
 0x171   : > { %2254 = vmatpush.msrb.mxu0 %v1641_v60  ;;  %2274 = vmatpush.msrb.mxu1 %v1657_v57  ;;  %v1113_v60 = vld.sshfl [vmem:[#allocation1 + $0x28] sm:$0xff pattern:$0x75316420] }
 0x172   : > { %2227 = vmatpush.msra.mxu2 %v1596_v61  ;;  %2247 = vmatpush.msra.mxu3 %v1612_v0  ;;  %v1628_v57 = vld [vmem:[#allocation9 + $0xe00] sm:$0xff]  ;;  %v979_v0 = vadd.f32 %v978_v42, %v3083_v62 }
 0x173   : > { %2228 = vmatmul.f32.vlgmr.msra.gmra.mxu2 %v1174_v52  ;;  %2248 = vmatmul.f32.vlgmr.msra.gmra.mxu3 %v1175_v1  ;;  %v1644_v61 = vld [vmem:[#allocation9 + $0xe80] sm:$0xff]  ;;  %v999_v52 = vadd.f32 %v998_v22, %v3083_v62  ;;  %v1663_v1 = vld [vmem:[#allocation9 + $0xf18] sm:$0xff]  ;;  %v1677_v62 = vld [vmem:[#allocation9 + $0xf88] sm:$0xff] }
 0x174   : > { %2255 = vmatpush.msrb.mxu0 %v1640_v2  ;;  %2275 = vmatpush.msrb.mxu1 %v1656_v6  ;;  %v1679_v2 = vld [vmem:[#allocation9 + $0xf98] sm:$0xff]  ;;  %v1176_v6 = vmul.f32 %v1112_v51, %v1029_v4 }
 0x175   : > { %2292 = vmatpush.msrb.mxu2 %v1675_v59  ;;  %2312 = vmatpush.msrb.mxu3 %v1691_v10  ;;  %v1177_v59 = vmul.f32 %v1113_v60, %v1030_v53  ;;  %v1662_v10 = vld [vmem:[#allocation9 + $0xf10] sm:$0xff] }
 0x176   : > { %2256 = vmatpush.msrb.mxu0 %v1639_v11  ;;  %2276 = vmatpush.msrb.mxu1 %v1655_v35  ;;  %v1678_v11 = vld [vmem:[#allocation9 + $0xf90] sm:$0xff]  ;;  %v1031_v35 = vmax.f32 %v979_v0, 0.0 }
 0x177   : > { %2293 = vmatpush.msrb.mxu2 %v1674_v12  ;;  %2313 = vmatpush.msrb.mxu3 %v1690_v40  ;;  %v1032_v12 = vmax.f32 %v999_v52, 0.0  ;;  %v1661_v40 = vld [vmem:[#allocation9 + $0xf08] sm:$0xff] }
 0x178   : > { %2257 = vmatpush.msrb.mxu0 %v1638_v17  ;;  %2277 = vmatpush.msrb.mxu1 %v1654_v18  ;;  %v1114_v17 = vld.sshfl [vmem:[#allocation1 + $0x30] sm:$0xff pattern:$0x75316420]  ;;  %v1115_v18 = vld.sshfl [vmem:[#allocation1 + $0x38] sm:$0xff pattern:$0x75316420] }
 0x179   : > { %2294 = vmatpush.msrb.mxu2 %v1673_v21  ;;  %2314 = vmatpush.msrb.mxu3 %v1689_v46  ;;  %v1660_v21 = vld [vmem:[#allocation9 + $0xf00] sm:$0xff] }
 0x17a   : > { %2258 = vmatpush.msrb.mxu0 %v1637_v14  ;;  %2278 = vmatpush.msrb.mxu1 %v1653_v29  ;;  %v1676_v46 = vld [vmem:[#allocation9 + $0xf80] sm:$0xff]  ;;  %v1178_v14 = vmul.f32 %v1114_v17, %v1031_v35  ;;  %v1179_v29 = vmul.f32 %v1115_v18, %v1032_v12 }
 0x17b   : > { %2295 = vmatpush.msrb.mxu2 %v1672_v54  ;;  %2315 = vmatpush.msrb.mxu3 %v1688_v63  ;;  %v1709_v54 = vpop.f32.mrf.mxu0  ;;  %v1729_v63 = vpop.f32.mrf.mxu1 }
 0x17c   : > { %2259 = vmatpush.msrb.mxu0 %v1636_v55  ;;  %2279 = vmatpush.msrb.mxu1 %v1652_v56  ;;  %v1749_v55 = vpop.f32.mrf.mxu2  ;;  %v1730_v56 = vadd.f32 %v1729_v63, %v1709_v54 }
 0x17d   : > { %2296 = vmatpush.msrb.mxu2 %v1671_v25  ;;  %2316 = vmatpush.msrb.mxu3 %v1687_v26  ;;  %v1769_v26 = vpop.f32.mrf.mxu3 }
 0x17e   : > { %2260 = vmatpush.msrb.mxu0 %v1635_v27  ;;  %2280 = vmatpush.msrb.mxu1 %v1651_v58  ;;  %v1750_v25 = vadd.f32 %v1749_v55, %v1730_v56 }
 0x17f   : > { %2297 = vmatpush.msrb.mxu2 %v1670_v31  ;;  %2317 = vmatpush.msrb.mxu3 %v1686_v7 }
 0x180   : > { %2261 = vmatpush.msrb.mxu0 %v1634_v34  ;;  %2281 = vmatpush.msrb.mxu1 %v1650_v36  ;;  %v1770_v27 = vadd.f32 %v1769_v26, %v1750_v25  ;;  %v2344_v25 = vpop.permute.xlu0 %2343 }
 0x181   : > { %2298 = vmatpush.msrb.mxu2 %v1669_v13  ;;  %2318 = vmatpush.msrb.mxu3 %v1685_v37 }
 0x182   : > { %2262 = vmatpush.msrb.mxu0 %v1633_v45  ;;  %2282 = vmatpush.msrb.mxu1 %v1649_v47 }
 0x183   : > { %2299 = vmatpush.msrb.mxu2 %v1668_v38  ;;  %2319 = vmatpush.msrb.mxu3 %v1684_v16  ;;  %v1789_v58 = vpop.f32.mrf.mxu0  ;;  %v1809_v7 = vpop.f32.mrf.mxu1 }
 0x184   : > { %2263 = vmatpush.msrb.mxu0 %v1632_v41  ;;  %2283 = vmatpush.msrb.mxu1 %v1648_v20  ;;  %v1790_v31 = vadd.f32 %v1789_v58, %v1770_v27  ;;  %v1829_v36 = vpop.f32.mrf.mxu2  ;;  %v2346_v27 = vperm.slane %v2344_v25, 0 }
 0x185   : > { %2300 = vmatpush.msrb.mxu2 %v1667_v44  ;;  %2320 = vmatpush.msrb.mxu3 %v1683_v28  ;;  %v1849_v37 = vpop.f32.mrf.mxu3 }
 0x186   : > { %2264 = vmatpush.msrb.mxu0 %v1631_v30  ;;  %2284 = vmatpush.msrb.mxu1 %v1647_v32  ;;  %v1810_v34 = vadd.f32 %v1809_v7, %v1790_v31 }
 0x187   : > { %2301 = vmatpush.msrb.mxu2 %v1666_v8  ;;  %2321 = vmatpush.msrb.mxu3 %v1682_v9 }
 0x188   : > { %2265 = vmatpush.msrb.mxu0 %v1630_v15  ;;  %2285 = vmatpush.msrb.mxu1 %v1646_v23  ;;  %v1830_v13 = vadd.f32 %v1829_v36, %v1810_v34 }
 0x189   : > { %2302 = vmatpush.msrb.mxu2 %v1665_v24  ;;  %2322 = vmatpush.msrb.mxu3 %v1681_v49 }
 0x18a   : > { %2266 = vmatpush.msrb.mxu0 %v1629_v43  ;;  %2286 = vmatpush.msrb.mxu1 %v1645_v3  ;;  %v1850_v47 = vadd.f32 %v1849_v37, %v1830_v13 }
 0x18b   : > { %2303 = vmatpush.msrb.mxu2 %v1664_v33  ;;  %2323 = vmatpush.msrb.mxu3 %v1680_v5  ;;  %v1869_v45 = vpop.f32.mrf.mxu0  ;;  %v1889_v16 = vpop.f32.mrf.mxu1 }
 0x18c   : > { %2267 = vmatpush.msrb.mxu0 %v1628_v57  ;;  %2287 = vmatpush.msrb.mxu1 %v1644_v61  ;;  %v1870_v38 = vadd.f32 %v1869_v45, %v1850_v47  ;;  %v1909_v39 = vpop.f32.mrf.mxu2 }
 0x18d   : > { %2304 = vmatpush.msrb.mxu2 %v1663_v1  ;;  %2324 = vmatpush.msrb.mxu3 %v1679_v2  ;;  %v1929_v20 = vpop.f32.mrf.mxu3 }
 0x18e   : > { %2268 = vmatmul.f32.vlgmr.msrb.gmra.mxu0 %v1176_v6  ;;  %2288 = vmatmul.f32.vlgmr.msrb.gmra.mxu1 %v1177_v59  ;;  %v1890_v19 = vadd.f32 %v1889_v16, %v1870_v38 }
 0x18f   : > { %2305 = vmatpush.msrb.mxu2 %v1662_v10  ;;  %2325 = vmatpush.msrb.mxu3 %v1678_v11 }
 0x190   : > { %v1910_v41 = vadd.f32 %v1909_v39, %v1890_v19 }
 0x191   : > { %2306 = vmatpush.msrb.mxu2 %v1661_v40  ;;  %2326 = vmatpush.msrb.mxu3 %v1677_v62 }
 0x192   : > { %v1930_v28 = vadd.f32 %v1929_v20, %v1910_v41 }
 0x193   : > { %2307 = vmatpush.msrb.mxu2 %v1660_v21  ;;  %2327 = vmatpush.msrb.mxu3 %v1676_v46  ;;  %v1949_v44 = vpop.f32.mrf.mxu0  ;;  %v1969_v32 = vpop.f32.mrf.mxu1 }
 0x194   : > { %2308 = vmatmul.f32.vlgmr.msrb.gmra.mxu2 %v1178_v14  ;;  %2328 = vmatmul.f32.vlgmr.msrb.gmra.mxu3 %v1179_v29  ;;  %v1950_v30 = vadd.f32 %v1949_v44, %v1930_v28  ;;  %v1989_v50 = vpop.f32.mrf.mxu2 }
 0x195   : > { %v2009_v9 = vpop.f32.mrf.mxu3 }
 0x196   : > { %v1970_v48 = vadd.f32 %v1969_v32, %v1950_v30 }
 0x198   : > { %v1990_v8 = vadd.f32 %v1989_v50, %v1970_v48 }
 0x19a   : > { %v2010_v23 = vadd.f32 %v2009_v9, %v1990_v8 }
 0x1a5   : > { %v2029_v15 = vpop.f32.mrf.mxu0  ;;  %v2049_v49 = vpop.f32.mrf.mxu1 }
 0x1a6   : > { %v2030_v24 = vadd.f32 %v2029_v15, %v2010_v23 }
 0x1a8   : > { %v2050_v42 = vadd.f32 %v2049_v49, %v2030_v24 }
 0x1b2   : > { %v2069_v51 = vpop.f32.mrf.mxu2  ;;  %v2089_v43 = vpop.f32.mrf.mxu3 }
 0x1b3   : > { %v2070_v22 = vadd.f32 %v2069_v51, %v2050_v42 }
 0x1b5   : > { %v2090_v4 = vadd.f32 %v2089_v43, %v2070_v22 }
 0x1c7   : > { %v2109_v3 = vpop.f32.mrf.mxu0  ;;  %v2129_v33 = vpop.f32.mrf.mxu1 }
 0x1c8   : > { %v2110_v53 = vadd.f32 %v2109_v3, %v2090_v4 }
 0x1ca   : > { %v2130_v60 = vadd.f32 %v2129_v33, %v2110_v53 }
 0x1d4   : > { %v2149_v5 = vpop.f32.mrf.mxu2  ;;  %v2169_v61 = vpop.f32.mrf.mxu3 }
 0x1d5   : > { %v2150_v57 = vadd.f32 %v2149_v5, %v2130_v60 }
 0x1d7   : > { %v2170_v52 = vadd.f32 %v2169_v61, %v2150_v57 }
 0x1e9   : > { %v2189_v0 = vpop.f32.mrf.mxu0  ;;  %v2209_v2 = vpop.f32.mrf.mxu1 }
 0x1ea   : > { %v2190_v1 = vadd.f32 %v2189_v0, %v2170_v52 }
 0x1ec   : > { %v2210_v59 = vadd.f32 %v2209_v2, %v2190_v1 }
 0x1f6   : > { %v2229_v6 = vpop.f32.mrf.mxu2  ;;  %v2249_v11 = vpop.f32.mrf.mxu3 }
 0x1f7   : > { %v2230_v10 = vadd.f32 %v2229_v6, %v2210_v59 }
 0x1f9   : > { %v2250_v12 = vadd.f32 %v2249_v11, %v2230_v10 }
 0x20b   : > { %v2269_v35 = vpop.f32.mrf.mxu0  ;;  %v2289_v62 = vpop.f32.mrf.mxu1 }
 0x20c   : > { %v2270_v40 = vadd.f32 %v2269_v35, %v2250_v12 }
 0x20e   : > { %v2290_v17 = vadd.f32 %v2289_v62, %v2270_v40 }
 0x217   : > { %v2309_v18 = vpop.f32.mrf.mxu2  ;;  %v2329_v46 = vpop.f32.mrf.mxu3 }
 0x218   : > { %v2310_v21 = vadd.f32 %v2309_v18, %v2290_v17 }
 0x21a   : > { %v2330_v14 = vadd.f32 %v2329_v46, %v2310_v21 }
 0x21c   : > { %v2333_v29 = vsel %vm2332_vm1, %v2330_v14, 0.0 }
 0x21d   : > { %v2334_v54 = vrot.slane %v2333_v29, 4 }
 0x21f   : > { %v2335_v63 = vadd.f32 %v2334_v54, %v2333_v29 }
 0x221   : > { %v2336_v55 = vrot.slane %v2335_v63, 2 }
 0x223   : > { %v2337_v56 = vadd.f32 %v2336_v55, %v2335_v63 }
 0x225   : > { %v2338_v26 = vrot.slane %v2337_v56, 1 }
 0x227   : > { %v2339_v58 = vadd.f32 %v2338_v26, %v2337_v56 }
 0x229   : > { %v2347_v31 = vadd.f32 %v2346_v27, %v2339_v58 }
 0x22b   : > { %2348 = vst [vmem:[%s316_s27] sm:$0x1] %v2347_v31 }
 0x22c   : > { %2734 = shalt.err (!%p2731_p11)
}
 0x22d   : > { %2520 = dma.vmem_to_hbm [thread:$0]  (%p2909_p3), %s2361_s30, 16, %s2363_s8, %s2350_s14  }
 0x22e PF: > { %s2374_s13 = sand.u32 1, %s2769_s23   ;;  %p3256_p12 = scmp.ge.s32.totalorder %s2781_s26, 2 }
 0x22f   : > { %s2375_s28 = scalar_lea.sflag [#allocation5], %s2374_s13 }
 0x230   : > { %p2537_p13 = pnand %p3256_p12, %p2862_p6 }
 0x232   : > { %p2538_p0 = pneg %p2537_p13 }
 0x234   : > { %2764 = dma.done.wait (%p2538_p0), %s2375_s28, 16  }
 0x235   : > { %2766 = vsyncadd (%p2538_p0), %s2375_s28, 4294967280  ;;  %p23_p5 = scmp.ge.s32.totalorder %s2896_s7, 4   ;;  %s3257_s23 = smov %s2773_s24 }
 0x236   : > { %s3258_s24 = smov %s2777_s25  ;;  %s3259_s25 = smov %s2905_s11 }
 0x237   : > { %s3260_s26 = smov %s2896_s7  ;;  %25 = sbr.rel (!%p23_p5) target bundleno = 10 (0xa), region = 104 }
 0x23c   :  { %2380 = vsyncpa [#allocation4], 1 }
 0x23d   :  { %2382 = vsyncpa [#allocation4 + $0x1], 1 }
 0x23e   :  { %2383 = vsyncpa [#allocation7], 1 }
 0x23f   :  { %2384 = vsyncpa [#allocation10], 1 }
 0x240   :  { %2385 = vsyncpa [#allocation5], 1 }
 0x241   :  { %2387 = vsyncpa [#allocation5 + $0x1], 1 }

</bundles_post_ra>
